<compile_context>
chip_gen: v6e
topology: v6e:2x2x1
jax: 0.10.0
libtpu: 0.0.40
codegen_flags: <defaults>
</compile_context>

<pallas_src>
import functools

import jax
import jax.numpy as jnp
from jax import lax
from jax.experimental import pallas as pl
from jax.experimental.pallas import tpu as pltpu


_W_OFF = 8  # sublane-aligned column offset of the real data inside the dw scratch


# ----------------------------------------------------------------------------
# Fused Pallas kernels
# ----------------------------------------------------------------------------
def _dw3x3_from_scratch(pad_ref, wd_ref, bd_ref, H, W, CP):
    """3x3 depthwise conv (stride 1, pad 1) + folded BN; taps read from the
    zero-padded VMEM scratch Ref at their 9 static offsets."""
    acc = jnp.zeros((H, W, CP), jnp.float32)
    for kh in range(3):
        for kw in range(3):
            c0 = _W_OFF - 1 + kw
            tap = pad_ref[kh:kh + H, c0:c0 + W, :]
            acc = acc + tap * wd_ref[kh * 3 + kw, :]
    return (acc + bd_ref[0, :]).reshape(H * W, CP)


def _fill_scratch(pad_ref, y_hw, H, W):
    """Zero the scratch and place y (H, W, CP) at a sublane-aligned interior."""
    pad_ref[...] = jnp.zeros_like(pad_ref)
    pad_ref[1:H + 1, _W_OFF:_W_OFF + W, :] = y_hw


def _unit_s1_kernel(x_ref, w1_ref, b1_ref, wd_ref, bd_ref, w2_ref, b2_ref,
                    o_ref, pad_ref, *, H, W):
    """Fused branch2 for stride 1: 1x1+BN+ReLU -> dw3x3+BN -> 1x1+BN+ReLU."""
    CP = pad_ref.shape[-1]
    x = x_ref[0]                                                    # (H*W, CP)
    y1 = jnp.dot(x, w1_ref[...], preferred_element_type=jnp.float32)
    y1 = jnp.maximum(y1 + b1_ref[...], 0.0)
    _fill_scratch(pad_ref, y1.reshape(H, W, CP), H, W)
    y2 = _dw3x3_from_scratch(pad_ref, wd_ref, bd_ref, H, W, CP)     # (H*W, CP)
    y3 = jnp.dot(y2, w2_ref[...], preferred_element_type=jnp.float32)
    o_ref[0] = jnp.maximum(y3 + b2_ref[...], 0.0).astype(o_ref.dtype)


def _unit_s2_kernel(x_ref,
                    wd1_ref, bd1_ref, wp1_ref, bp1_ref,             # branch1
                    w21_ref, b21_ref, wd2_ref, bd2_ref, w22_ref, b22_ref,  # branch2
                    sel_ref, o1_ref, o2_ref, pad_ref, *, H, W):
    """Fused stride-2 unit: both branches, input read once; stride-2 applied
    in-kernel via a 0/1 selection matmul over the flattened spatial axis."""
    CP = pad_ref.shape[-1]
    x = x_ref[0]                                                    # (H*W, CP)

    # ---- branch1: dw3x3 (stride 2) + BN -> 1x1 + BN + ReLU
    _fill_scratch(pad_ref, x.reshape(H, W, CP), H, W)
    d1 = _dw3x3_from_scratch(pad_ref, wd1_ref, bd1_ref, H, W, CP)
    d1 = jnp.dot(sel_ref[...], d1, preferred_element_type=jnp.float32)  # stride-2 pick
    y1 = jnp.dot(d1, wp1_ref[...], preferred_element_type=jnp.float32)
    o1_ref[0] = jnp.maximum(y1 + bp1_ref[...], 0.0).astype(o1_ref.dtype)

    # ---- branch2: 1x1 + BN + ReLU -> dw3x3 (stride 2) + BN -> 1x1 + BN + ReLU
    z1 = jnp.dot(x, w21_ref[...], preferred_element_type=jnp.float32)
    z1 = jnp.maximum(z1 + b21_ref[...], 0.0)
    _fill_scratch(pad_ref, z1.reshape(H, W, CP), H, W)
    d2 = _dw3x3_from_scratch(pad_ref, wd2_ref, bd2_ref, H, W, CP)
    d2 = jnp.dot(sel_ref[...], d2, preferred_element_type=jnp.float32)
    y2 = jnp.dot(d2, w22_ref[...], preferred_element_type=jnp.float32)
    o2_ref[0] = jnp.maximum(y2 + b22_ref[...], 0.0).astype(o2_ref.dtype)


# ----------------------------------------------------------------------------
# pallas_call wrappers
# ----------------------------------------------------------------------------
def _rep2(shape):
    # 2-D parameter broadcast across the batch grid (fetched once).
    return pl.BlockSpec(shape, lambda n: (0, 0))


def _call_unit_s1(x_flat, w1, b1, wd, bd, w2, b2, *, H, W):
    N, HW, CP = x_flat.shape
    return pl.pallas_call(
        functools.partial(_unit_s1_kernel, H=H, W=W),
        out_shape=jax.ShapeDtypeStruct((N, HW, CP), x_flat.dtype),
        grid_spec=pltpu.PrefetchScalarGridSpec(
            num_scalar_prefetch=0,
            grid=(N,),
            in_specs=[
                pl.BlockSpec((1, HW, CP), lambda n: (n, 0, 0)),
                _rep2(w1.shape), _rep2(b1.shape),
                _rep2(wd.shape), _rep2(bd.shape),
                _rep2(w2.shape), _rep2(b2.shape),
            ],
            out_specs=pl.BlockSpec((1, HW, CP), lambda n: (n, 0, 0)),
            scratch_shapes=[pltpu.VMEM((H + 2, W + 2 * _W_OFF, CP), jnp.float32)],
        ),
        compiler_params=pltpu.CompilerParams(dimension_semantics=("parallel",)),
    )(x_flat, w1, b1, wd, bd, w2, b2)


def _call_unit_s2(x_flat, br1_ops, br2_ops, sel, *, H, W, Ho, Wo):
    N, HW, CP = x_flat.shape
    HWo = Ho * Wo
    params = br1_ops + br2_ops + (sel,)
    return pl.pallas_call(
        functools.partial(_unit_s2_kernel, H=H, W=W),
        out_shape=(jax.ShapeDtypeStruct((N, HWo, CP), x_flat.dtype),
                   jax.ShapeDtypeStruct((N, HWo, CP), x_flat.dtype)),
        grid_spec=pltpu.PrefetchScalarGridSpec(
            num_scalar_prefetch=0,
            grid=(N,),
            in_specs=[pl.BlockSpec((1, HW, CP), lambda n: (n, 0, 0))]
                     + [_rep2(a.shape) for a in params],
            out_specs=(pl.BlockSpec((1, HWo, CP), lambda n: (n, 0, 0)),
                       pl.BlockSpec((1, HWo, CP), lambda n: (n, 0, 0))),
            scratch_shapes=[pltpu.VMEM((H + 2, W + 2 * _W_OFF, CP), jnp.float32)],
        ),
        compiler_params=pltpu.CompilerParams(dimension_semantics=("parallel",)),
    )(x_flat, *params)


# ----------------------------------------------------------------------------
# Parameter folding / padding helpers
# ----------------------------------------------------------------------------
def _round_up(v, m):
    return (v + m - 1) // m * m


def _pad_last(a, target):
    p = target - a.shape[-1]
    if p == 0:
        return a
    return jnp.pad(a, [(0, 0)] * (a.ndim - 1) + [(0, p)])


def _fold_pw(w, bn, cin_offset, cp):
    """BN scale folded into a 1x1-conv weight, embedded lane-dense at (cp, cp)."""
    scale, bias = bn
    wf = (w * scale[None, :]).astype(jnp.float32)
    cin, cout = wf.shape
    wfull = jnp.zeros((cp, cp), jnp.float32).at[cin_offset:cin_offset + cin, :cout].set(wf)
    bfull = jnp.zeros((1, cp), jnp.float32).at[0, :cout].set(bias)
    return wfull, bfull


def _fold_dw(w9, bn, cp):
    """BN scale folded into the 9-tap depthwise weight, padded to cp lanes."""
    scale, bias = bn
    wf = (w9 * scale[None, :]).astype(jnp.float32)
    c = wf.shape[1]
    wfull = jnp.zeros((9, cp), jnp.float32).at[:, :c].set(wf)
    bfull = jnp.zeros((1, cp), jnp.float32).at[0, :c].set(bias)
    return wfull, bfull


def _stride2_sel(H, W):
    """0/1 matrix selecting the stride-2 pixels of a flattened (H*W) map."""
    Ho = (H - 1) // 2 + 1
    Wo = (W - 1) // 2 + 1
    rows = jnp.arange(Ho * Wo)
    src = (rows // Wo) * (2 * W) + (rows % Wo) * 2
    sel = (src[:, None] == jnp.arange(H * W)[None, :]).astype(jnp.float32)
    return sel, Ho, Wo


# ----------------------------------------------------------------------------
# Parameter construction (deterministic, synthetic)
# ----------------------------------------------------------------------------
def _make_bn(key, c, eps=1e-5):
    k1, k2, k3, k4 = jax.random.split(key, 4)
    gamma = jax.random.uniform(k1, (c,), jnp.float32, 0.5, 1.5)
    beta = 0.1 * jax.random.normal(k2, (c,), jnp.float32)
    mean = 0.1 * jax.random.normal(k3, (c,), jnp.float32)
    var = jax.random.uniform(k4, (c,), jnp.float32, 0.5, 1.5)
    scale = gamma * lax.rsqrt(var + eps)   # fold BN (eval mode) into scale/bias
    bias = beta - mean * scale
    return scale, bias


def _make_pw(key, cin, cout):
    # weight laid out (Cin, Cout) (== PyTorch (Cout,Cin,1,1) transposed)
    return 0.1 * jax.random.normal(key, (cin, cout), jnp.float32)


def _make_dw(key, c):
    # depthwise 3x3 weight, rows are kh*3+kw
    return 0.1 * jax.random.normal(key, (9, c), jnp.float32)


def init_shuffle_unit(key, in_channels, out_channels, dw_conv_stride):
    branch_channels = out_channels // 2
    keys = jax.random.split(key, 10)
    params = {"stride": dw_conv_stride,
              "in_channels": in_channels,
              "branch_channels": branch_channels}
    if dw_conv_stride == 1:
        branch2_input = branch_channels
        params["branch1"] = None
    else:
        branch2_input = in_channels
        params["branch1"] = {
            "dw_w": _make_dw(keys[0], in_channels),
            "dw_bn": _make_bn(keys[1], in_channels),
            "pw_w": _make_pw(keys[2], in_channels, branch_channels),
            "pw_bn": _make_bn(keys[3], branch_channels),
        }
    params["branch2"] = {
        "pw1_w": _make_pw(keys[4], branch2_input, branch_channels),
        "pw1_bn": _make_bn(keys[5], branch_channels),
        "dw_w": _make_dw(keys[6], branch_channels),
        "dw_bn": _make_bn(keys[7], branch_channels),
        "pw2_w": _make_pw(keys[8], branch_channels, branch_channels),
        "pw2_bn": _make_bn(keys[9], branch_channels),
    }
    return params


# ----------------------------------------------------------------------------
# ShuffleUnit forward (fused Pallas path)
# ----------------------------------------------------------------------------
def _channel_shuffle_nhwc(x, groups):
    n, h, w, c = x.shape
    x = x.reshape(n, h, w, groups, c // groups)
    x = jnp.transpose(x, (0, 1, 2, 4, 3))
    return x.reshape(n, h, w, c)


def shuffle_unit_forward(params, x_nchw):
    stride = params["stride"]
    cb = params["branch_channels"]
    N, C, H, W = x_nchw.shape
    CP = _round_up(max(C, cb), 128)

    x = jnp.transpose(x_nchw, (0, 2, 3, 1))            # NCHW -> NHWC
    x_flat = _pad_last(x, CP).reshape(N, H * W, CP)    # lane-dense, flat spatial

    p2 = params["branch2"]
    if stride == 1:
        # branch2 consumes the second channel half; realized by embedding
        # pw1's weight at row offset C//2 so the kernel reads the full padded
        # activation and no separate channel-split HBM pass is needed.
        w1, b1 = _fold_pw(p2["pw1_w"], p2["pw1_bn"], C // 2, CP)
        wd, bd = _fold_dw(p2["dw_w"], p2["dw_bn"], CP)
        w2, b2 = _fold_pw(p2["pw2_w"], p2["pw2_bn"], 0, CP)
        out2 = _call_unit_s1(x_flat, w1, b1, wd, bd, w2, b2, H=H, W=W)
        br2 = out2.reshape(N, H, W, CP)[..., :cb]
        br1 = x[..., :C // 2]
    else:
        p1 = params["branch1"]
        sel, Ho, Wo = _stride2_sel(H, W)
        br1_ops = (_fold_dw(p1["dw_w"], p1["dw_bn"], CP)
                   + _fold_pw(p1["pw_w"], p1["pw_bn"], 0, CP))
        br2_ops = (_fold_pw(p2["pw1_w"], p2["pw1_bn"], 0, CP)
                   + _fold_dw(p2["dw_w"], p2["dw_bn"], CP)
                   + _fold_pw(p2["pw2_w"], p2["pw2_bn"], 0, CP))
        out1, out2 = _call_unit_s2(x_flat, br1_ops, br2_ops, sel,
                                   H=H, W=W, Ho=Ho, Wo=Wo)
        br1 = out1.reshape(N, Ho, Wo, CP)[..., :cb]
        br2 = out2.reshape(N, Ho, Wo, CP)[..., :cb]

    # TODO(synk): fold concat + channel_shuffle + NHWC->NCHW into the kernels'
    # output index_maps to remove these remaining XLA layout passes.
    y = jnp.concatenate([br1, br2], axis=-1)
    y = _channel_shuffle_nhwc(y, groups=2)
    return jnp.transpose(y, (0, 3, 1, 2))              # NHWC -> NCHW


# ----------------------------------------------------------------------------
# Pure-JAX reference (for correctness check)
# ----------------------------------------------------------------------------
def _ref_pw(x, w, scale, bias, relu):
    y = jnp.einsum("nhwc,cd->nhwd", x, w) * scale + bias
    return jnp.maximum(y, 0.0) if relu else y


def _ref_dw(x, w9, scale, bias, stride):
    C = x.shape[-1]
    wk = w9.reshape(3, 3, C)[:, :, None, :]  # HWIO, I=1 (grouped)
    y = lax.conv_general_dilated(
        x, wk, (stride, stride), ((1, 1), (1, 1)),
        dimension_numbers=("NHWC", "HWIO", "NHWC"),
        feature_group_count=C)
    return y * scale + bias


def ref_shuffle_unit(params, x_nchw):
    stride = params["stride"]
    x = jnp.transpose(x_nchw, (0, 2, 3, 1))

    def br2(p, x):
        x = _ref_pw(x, p["pw1_w"], *p["pw1_bn"], relu=True)
        x = _ref_dw(x, p["dw_w"], *p["dw_bn"], stride=stride)
        x = _ref_pw(x, p["pw2_w"], *p["pw2_bn"], relu=True)
        return x

    if stride == 1:
        c = x.shape[-1]
        y = jnp.concatenate([x[..., : c // 2], br2(params["branch2"], x[..., c // 2:])], axis=-1)
    else:
        p1 = params["branch1"]
        b1 = _ref_dw(x, p1["dw_w"], *p1["dw_bn"], stride=stride)
        b1 = _ref_pw(b1, p1["pw_w"], *p1["pw_bn"], relu=True)
        y = jnp.concatenate([b1, br2(params["branch2"], x)], axis=-1)
    y = _channel_shuffle_nhwc(y, groups=2)
    return jnp.transpose(y, (0, 3, 1, 2))


# ----------------------------------------------------------------------------
if __name__ == "__main__":
    key = jax.random.PRNGKey(0)
    k_x, k_p1, k_p2 = jax.random.split(key, 3)

    # Input in PyTorch NCHW convention.
    x = jax.random.normal(k_x, (2, 8, 16, 16), jnp.float32)

    # Case 1: stride 1 (identity branch1 + channel split).
    params_s1 = init_shuffle_unit(k_p1, in_channels=8, out_channels=8, dw_conv_stride=1)
    fwd_s1 = jax.jit(functools.partial(shuffle_unit_forward, params_s1))
    y1 = jax.block_until_ready(fwd_s1(x))
    r1 = ref_shuffle_unit(params_s1, x)
    assert y1.shape == (2, 8, 16, 16)
    assert jnp.allclose(y1, r1, atol=1e-4, rtol=1e-4), "stride-1 mismatch"

    # Case 2: stride 2 (both branches active, spatial downsample).
    params_s2 = init_shuffle_unit(k_p2, in_channels=8, out_channels=16, dw_conv_stride=2)
    fwd_s2 = jax.jit(functools.partial(shuffle_unit_forward, params_s2))
    y2 = jax.block_until_ready(fwd_s2(x))
    r2 = ref_shuffle_unit(params_s2, x)
    assert y2.shape == (2, 16, 8, 8)
    assert jnp.allclose(y2, r2, atol=1e-4, rtol=1e-4), "stride-2 mismatch"

    print("KERNEL_OK")
</pallas_src>

<mosaic_0001>
module attributes {stable_mosaic.version = 11 : i64} {
  func.func @_unit_s1_kernel(%arg0: i32, %arg1: memref<1x256x128xf32, #tpu.memory_space<vmem>>, %arg2: memref<128x128xf32, #tpu.memory_space<vmem>>, %arg3: memref<1x128xf32, #tpu.memory_space<vmem>>, %arg4: memref<9x128xf32, #tpu.memory_space<vmem>>, %arg5: memref<1x128xf32, #tpu.memory_space<vmem>>, %arg6: memref<128x128xf32, #tpu.memory_space<vmem>>, %arg7: memref<1x128xf32, #tpu.memory_space<vmem>>, %arg8: memref<1x256x128xf32, #tpu.memory_space<vmem>>, %arg9: memref<18x32x128xf32, #tpu.memory_space<vmem>>) attributes {dimension_semantics = [#tpu.dimension_semantics<parallel>], iteration_bounds = array<i64: 2>, scalar_prefetch = 0 : i64, scratch_operands = 1 : i64, tpu.core_type = #tpu.core_type<tc>, window_params = [{transform_indices = @transform_0, window_bounds = array<i64: 1, 256, 128>}, {pipeline_mode = #tpu.pipeline_mode<synchronous>, transform_indices = @transform_1, window_bounds = array<i64: 128, 128>}, {pipeline_mode = #tpu.pipeline_mode<synchronous>, transform_indices = @transform_2, window_bounds = array<i64: 1, 128>}, {pipeline_mode = #tpu.pipeline_mode<synchronous>, transform_indices = @transform_3, window_bounds = array<i64: 9, 128>}, {pipeline_mode = #tpu.pipeline_mode<synchronous>, transform_indices = @transform_4, window_bounds = array<i64: 1, 128>}, {pipeline_mode = #tpu.pipeline_mode<synchronous>, transform_indices = @transform_5, window_bounds = array<i64: 128, 128>}, {pipeline_mode = #tpu.pipeline_mode<synchronous>, transform_indices = @transform_6, window_bounds = array<i64: 1, 128>}, {transform_indices = @transform_7, window_bounds = array<i64: 1, 256, 128>}]} {
    %c0 = arith.constant 0 : index
    %c0_0 = arith.constant 0 : index
    %c0_1 = arith.constant 0 : index
    %0 = vector.load %arg1[%c0, %c0_0, %c0_1] : memref<1x256x128xf32, #tpu.memory_space<vmem>>, vector<1x256x128xf32>
    %1 = vector.shape_cast %0 : vector<1x256x128xf32> to vector<256x128xf32>
    %c0_2 = arith.constant 0 : index
    %c0_3 = arith.constant 0 : index
    %2 = vector.load %arg2[%c0_2, %c0_3] : memref<128x128xf32, #tpu.memory_space<vmem>>, vector<128x128xf32>
    %cst = arith.constant dense<0.000000e+00> : vector<256x128xf32>
    %3 = tpu.matmul %1, %2, %cst {dimension_numbers = #tpu.dot_dimension_numbers<[1], [0], [0], [1], [0, 0, 1, 1], [], []>} : vector<256x128xf32>, vector<128x128xf32>, vector<256x128xf32> -> vector<256x128xf32>
    %c0_4 = arith.constant 0 : index
    %c0_5 = arith.constant 0 : index
    %4 = vector.load %arg3[%c0_4, %c0_5] : memref<1x128xf32, #tpu.memory_space<vmem>>, vector<1x128xf32>
    %5 = vector.broadcast %4 : vector<1x128xf32> to vector<256x128xf32>
    %6 = arith.addf %3, %5 : vector<256x128xf32>
    %cst_6 = arith.constant 0.000000e+00 : f32
    %7 = vector.broadcast %cst_6 : f32 to vector<256x128xf32>
    %8 = arith.maximumf %6, %7 : vector<256x128xf32>
    %9 = vector.shape_cast %8 : vector<256x128xf32> to vector<16x16x128xf32>
    %cst_7 = arith.constant 0.000000e+00 : f32
    %10 = vector.broadcast %cst_7 : f32 to vector<18x32x128xf32>
    %c0_8 = arith.constant 0 : index
    %c0_9 = arith.constant 0 : index
    %c0_10 = arith.constant 0 : index
    %11 = vector.load %arg9[%c0_8, %c0_9, %c0_10] : memref<18x32x128xf32, #tpu.memory_space<vmem>>, vector<18x32x128xf32>
    tpu.vector_store %arg9[%c0_8, %c0_9, %c0_10], %10 {strides = array<i32>} : memref<18x32x128xf32, #tpu.memory_space<vmem>>, vector<18x32x128xf32>,
    %c1 = arith.constant 1 : index
    %c8 = arith.constant 8 : index
    %c0_11 = arith.constant 0 : index
    %12 = vector.load %arg9[%c1, %c8, %c0_11] : memref<18x32x128xf32, #tpu.memory_space<vmem>>, vector<16x16x128xf32>
    tpu.vector_store %arg9[%c1, %c8, %c0_11], %9 {strides = array<i32>} : memref<18x32x128xf32, #tpu.memory_space<vmem>>, vector<16x16x128xf32>,
    %cst_12 = arith.constant 0.000000e+00 : f32
    %13 = vector.broadcast %cst_12 : f32 to vector<16x16x128xf32>
    %c0_13 = arith.constant 0 : index
    %c7 = arith.constant 7 : index
    %c0_14 = arith.constant 0 : index
    %14 = vector.load %arg9[%c0_13, %c7, %c0_14] : memref<18x32x128xf32, #tpu.memory_space<vmem>>, vector<16x16x128xf32>
    %c0_15 = arith.constant 0 : index
    %c0_16 = arith.constant 0 : index
    %15 = vector.load %arg4[%c0_15, %c0_16] : memref<9x128xf32, #tpu.memory_space<vmem>>, vector<1x128xf32>
    %16 = vector.shape_cast %15 : vector<1x128xf32> to vector<128xf32>
    %17 = vector.shape_cast %16 : vector<128xf32> to vector<1x1x128xf32>
    %18 = vector.broadcast %17 : vector<1x1x128xf32> to vector<16x16x128xf32>
    %19 = arith.mulf %14, %18 : vector<16x16x128xf32>
    %20 = arith.addf %13, %19 : vector<16x16x128xf32>
    %c0_17 = arith.constant 0 : index
    %c8_18 = arith.constant 8 : index
    %c0_19 = arith.constant 0 : index
    %21 = vector.load %arg9[%c0_17, %c8_18, %c0_19] : memref<18x32x128xf32, #tpu.memory_space<vmem>>, vector<16x16x128xf32>
    %c1_20 = arith.constant 1 : index
    %c0_21 = arith.constant 0 : index
    %22 = vector.load %arg4[%c1_20, %c0_21] : memref<9x128xf32, #tpu.memory_space<vmem>>, vector<1x128xf32>
    %23 = vector.shape_cast %22 : vector<1x128xf32> to vector<128xf32>
    %24 = vector.shape_cast %23 : vector<128xf32> to vector<1x1x128xf32>
    %25 = vector.broadcast %24 : vector<1x1x128xf32> to vector<16x16x128xf32>
    %26 = arith.mulf %21, %25 : vector<16x16x128xf32>
    %27 = arith.addf %20, %26 : vector<16x16x128xf32>
    %c0_22 = arith.constant 0 : index
    %c9 = arith.constant 9 : index
    %c0_23 = arith.constant 0 : index
    %28 = vector.load %arg9[%c0_22, %c9, %c0_23] : memref<18x32x128xf32, #tpu.memory_space<vmem>>, vector<16x16x128xf32>
    %c2 = arith.constant 2 : index
    %c0_24 = arith.constant 0 : index
    %29 = vector.load %arg4[%c2, %c0_24] : memref<9x128xf32, #tpu.memory_space<vmem>>, vector<1x128xf32>
    %30 = vector.shape_cast %29 : vector<1x128xf32> to vector<128xf32>
    %31 = vector.shape_cast %30 : vector<128xf32> to vector<1x1x128xf32>
    %32 = vector.broadcast %31 : vector<1x1x128xf32> to vector<16x16x128xf32>
    %33 = arith.mulf %28, %32 : vector<16x16x128xf32>
    %34 = arith.addf %27, %33 : vector<16x16x128xf32>
    %c1_25 = arith.constant 1 : index
    %c7_26 = arith.constant 7 : index
    %c0_27 = arith.constant 0 : index
    %35 = vector.load %arg9[%c1_25, %c7_26, %c0_27] : memref<18x32x128xf32, #tpu.memory_space<vmem>>, vector<16x16x128xf32>
    %c3 = arith.constant 3 : index
    %c0_28 = arith.constant 0 : index
    %36 = vector.load %arg4[%c3, %c0_28] : memref<9x128xf32, #tpu.memory_space<vmem>>, vector<1x128xf32>
    %37 = vector.shape_cast %36 : vector<1x128xf32> to vector<128xf32>
    %38 = vector.shape_cast %37 : vector<128xf32> to vector<1x1x128xf32>
    %39 = vector.broadcast %38 : vector<1x1x128xf32> to vector<16x16x128xf32>
    %40 = arith.mulf %35, %39 : vector<16x16x128xf32>
    %41 = arith.addf %34, %40 : vector<16x16x128xf32>
    %c1_29 = arith.constant 1 : index
    %c8_30 = arith.constant 8 : index
    %c0_31 = arith.constant 0 : index
    %42 = vector.load %arg9[%c1_29, %c8_30, %c0_31] : memref<18x32x128xf32, #tpu.memory_space<vmem>>, vector<16x16x128xf32>
    %c4 = arith.constant 4 : index
    %c0_32 = arith.constant 0 : index
    %43 = vector.load %arg4[%c4, %c0_32] : memref<9x128xf32, #tpu.memory_space<vmem>>, vector<1x128xf32>
    %44 = vector.shape_cast %43 : vector<1x128xf32> to vector<128xf32>
    %45 = vector.shape_cast %44 : vector<128xf32> to vector<1x1x128xf32>
    %46 = vector.broadcast %45 : vector<1x1x128xf32> to vector<16x16x128xf32>
    %47 = arith.mulf %42, %46 : vector<16x16x128xf32>
    %48 = arith.addf %41, %47 : vector<16x16x128xf32>
    %c1_33 = arith.constant 1 : index
    %c9_34 = arith.constant 9 : index
    %c0_35 = arith.constant 0 : index
    %49 = vector.load %arg9[%c1_33, %c9_34, %c0_35] : memref<18x32x128xf32, #tpu.memory_space<vmem>>, vector<16x16x128xf32>
    %c5 = arith.constant 5 : index
    %c0_36 = arith.constant 0 : index
    %50 = vector.load %arg4[%c5, %c0_36] : memref<9x128xf32, #tpu.memory_space<vmem>>, vector<1x128xf32>
    %51 = vector.shape_cast %50 : vector<1x128xf32> to vector<128xf32>
    %52 = vector.shape_cast %51 : vector<128xf32> to vector<1x1x128xf32>
    %53 = vector.broadcast %52 : vector<1x1x128xf32> to vector<16x16x128xf32>
    %54 = arith.mulf %49, %53 : vector<16x16x128xf32>
    %55 = arith.addf %48, %54 : vector<16x16x128xf32>
    %c2_37 = arith.constant 2 : index
    %c7_38 = arith.constant 7 : index
    %c0_39 = arith.constant 0 : index
    %56 = vector.load %arg9[%c2_37, %c7_38, %c0_39] : memref<18x32x128xf32, #tpu.memory_space<vmem>>, vector<16x16x128xf32>
    %c6 = arith.constant 6 : index
    %c0_40 = arith.constant 0 : index
    %57 = vector.load %arg4[%c6, %c0_40] : memref<9x128xf32, #tpu.memory_space<vmem>>, vector<1x128xf32>
    %58 = vector.shape_cast %57 : vector<1x128xf32> to vector<128xf32>
    %59 = vector.shape_cast %58 : vector<128xf32> to vector<1x1x128xf32>
    %60 = vector.broadcast %59 : vector<1x1x128xf32> to vector<16x16x128xf32>
    %61 = arith.mulf %56, %60 : vector<16x16x128xf32>
    %62 = arith.addf %55, %61 : vector<16x16x128xf32>
    %c2_41 = arith.constant 2 : index
    %c8_42 = arith.constant 8 : index
    %c0_43 = arith.constant 0 : index
    %63 = vector.load %arg9[%c2_41, %c8_42, %c0_43] : memref<18x32x128xf32, #tpu.memory_space<vmem>>, vector<16x16x128xf32>
    %c7_44 = arith.constant 7 : index
    %c0_45 = arith.constant 0 : index
    %64 = vector.load %arg4[%c7_44, %c0_45] : memref<9x128xf32, #tpu.memory_space<vmem>>, vector<1x128xf32>
    %65 = vector.shape_cast %64 : vector<1x128xf32> to vector<128xf32>
    %66 = vector.shape_cast %65 : vector<128xf32> to vector<1x1x128xf32>
    %67 = vector.broadcast %66 : vector<1x1x128xf32> to vector<16x16x128xf32>
    %68 = arith.mulf %63, %67 : vector<16x16x128xf32>
    %69 = arith.addf %62, %68 : vector<16x16x128xf32>
    %c2_46 = arith.constant 2 : index
    %c9_47 = arith.constant 9 : index
    %c0_48 = arith.constant 0 : index
    %70 = vector.load %arg9[%c2_46, %c9_47, %c0_48] : memref<18x32x128xf32, #tpu.memory_space<vmem>>, vector<16x16x128xf32>
    %c8_49 = arith.constant 8 : index
    %c0_50 = arith.constant 0 : index
    %71 = vector.load %arg4[%c8_49, %c0_50] : memref<9x128xf32, #tpu.memory_space<vmem>>, vector<1x128xf32>
    %72 = vector.shape_cast %71 : vector<1x128xf32> to vector<128xf32>
    %73 = vector.shape_cast %72 : vector<128xf32> to vector<1x1x128xf32>
    %74 = vector.broadcast %73 : vector<1x1x128xf32> to vector<16x16x128xf32>
    %75 = arith.mulf %70, %74 : vector<16x16x128xf32>
    %76 = arith.addf %69, %75 : vector<16x16x128xf32>
    %c0_51 = arith.constant 0 : index
    %c0_52 = arith.constant 0 : index
    %77 = vector.load %arg5[%c0_51, %c0_52] : memref<1x128xf32, #tpu.memory_space<vmem>>, vector<1x128xf32>
    %78 = vector.shape_cast %77 : vector<1x128xf32> to vector<128xf32>
    %79 = vector.shape_cast %78 : vector<128xf32> to vector<1x1x128xf32>
    %80 = vector.broadcast %79 : vector<1x1x128xf32> to vector<16x16x128xf32>
    %81 = arith.addf %76, %80 : vector<16x16x128xf32>
    %82 = vector.shape_cast %81 : vector<16x16x128xf32> to vector<256x128xf32>
    %c0_53 = arith.constant 0 : index
    %c0_54 = arith.constant 0 : index
    %83 = vector.load %arg6[%c0_53, %c0_54] : memref<128x128xf32, #tpu.memory_space<vmem>>, vector<128x128xf32>
    %cst_55 = arith.constant dense<0.000000e+00> : vector<256x128xf32>
    %84 = tpu.matmul %82, %83, %cst_55 {dimension_numbers = #tpu.dot_dimension_numbers<[1], [0], [0], [1], [0, 0, 1, 1], [], []>} : vector<256x128xf32>, vector<128x128xf32>, vector<256x128xf32> -> vector<256x128xf32>
    %c0_56 = arith.constant 0 : index
    %c0_57 = arith.constant 0 : index
    %85 = vector.load %arg7[%c0_56, %c0_57] : memref<1x128xf32, #tpu.memory_space<vmem>>, vector<1x128xf32>
    %86 = vector.broadcast %85 : vector<1x128xf32> to vector<256x128xf32>
    %87 = arith.addf %84, %86 : vector<256x128xf32>
    %cst_58 = arith.constant 0.000000e+00 : f32
    %88 = vector.broadcast %cst_58 : f32 to vector<256x128xf32>
    %89 = arith.maximumf %87, %88 : vector<256x128xf32>
    %c0_59 = arith.constant 0 : index
    %c0_60 = arith.constant 0 : index
    %c0_61 = arith.constant 0 : index
    %90 = vector.load %arg8[%c0_59, %c0_60, %c0_61] : memref<1x256x128xf32, #tpu.memory_space<vmem>>, vector<1x256x128xf32>
    %91 = vector.shape_cast %90 : vector<1x256x128xf32> to vector<256x128xf32>
    %92 = vector.shape_cast %89 : vector<256x128xf32> to vector<1x256x128xf32>
    tpu.vector_store %arg8[%c0_59, %c0_60, %c0_61], %92 {strides = array<i32>} : memref<1x256x128xf32, #tpu.memory_space<vmem>>, vector<1x256x128xf32>,
    return
  }
  func.func @transform_0(%arg0: i32) -> (i32, i32, i32) {
    %c0_i32 = arith.constant 0 : i32
    %c0_i32_0 = arith.constant 0 : i32
    %c0_i32_1 = arith.constant 0 : i32
    return %arg0, %c0_i32, %c0_i32_0 : i32, i32, i32
  }
  func.func @transform_1(%arg0: i32) -> (i32, i32) {
    %c0_i32 = arith.constant 0 : i32
    %c0_i32_0 = arith.constant 0 : i32
    %c0_i32_1 = arith.constant 0 : i32
    return %c0_i32, %c0_i32_0 : i32, i32
  }
  func.func @transform_2(%arg0: i32) -> (i32, i32) {
    %c0_i32 = arith.constant 0 : i32
    %c0_i32_0 = arith.constant 0 : i32
    %c0_i32_1 = arith.constant 0 : i32
    return %c0_i32, %c0_i32_0 : i32, i32
  }
  func.func @transform_3(%arg0: i32) -> (i32, i32) {
    %c0_i32 = arith.constant 0 : i32
    %c0_i32_0 = arith.constant 0 : i32
    %c0_i32_1 = arith.constant 0 : i32
    return %c0_i32, %c0_i32_0 : i32, i32
  }
  func.func @transform_4(%arg0: i32) -> (i32, i32) {
    %c0_i32 = arith.constant 0 : i32
    %c0_i32_0 = arith.constant 0 : i32
    %c0_i32_1 = arith.constant 0 : i32
    return %c0_i32, %c0_i32_0 : i32, i32
  }
  func.func @transform_5(%arg0: i32) -> (i32, i32) {
    %c0_i32 = arith.constant 0 : i32
    %c0_i32_0 = arith.constant 0 : i32
    %c0_i32_1 = arith.constant 0 : i32
    return %c0_i32, %c0_i32_0 : i32, i32
  }
  func.func @transform_6(%arg0: i32) -> (i32, i32) {
    %c0_i32 = arith.constant 0 : i32
    %c0_i32_0 = arith.constant 0 : i32
    %c0_i32_1 = arith.constant 0 : i32
    return %c0_i32, %c0_i32_0 : i32, i32
  }
  func.func @transform_7(%arg0: i32) -> (i32, i32, i32) {
    %c0_i32 = arith.constant 0 : i32
    %c0_i32_0 = arith.constant 0 : i32
    %c0_i32_1 = arith.constant 0 : i32
    return %arg0, %c0_i32, %c0_i32_0 : i32, i32, i32
  }
}

</mosaic_0001>

<bundles_post_ra>
// kernel: shuffle_unit_forward.1
= control target key start
LH: loop header
LB: loop body
LE: loop exit
PB: predicated region body
PF: predicated region fallthrough
CT: control target
= control target key end

     0   :  { %s2362_s24 = smov 0   ;;  %s3391_s0 = inlined_call_operand.vmem [shape: f32[2,256,128], index: 0, kind: input, shape index: {}]   ;;  %s3392_s1 = inlined_call_operand.vmem [shape: f32[128,128], index: 1, kind: input, shape index: {}]   ;;  %s3393_s2 = inlined_call_operand.vmem [shape: f32[1,128], index: 2, kind: input, shape index: {}]   ;;  %s3394_s3 = inlined_call_operand.vmem [shape: f32[9,128], index: 3, kind: input, shape index: {}]   ;;  %s3395_s4 = inlined_call_operand.vmem [shape: f32[1,128], index: 4, kind: input, shape index: {}]   ;;  %s3396_s5 = inlined_call_operand.vmem [shape: f32[128,128], index: 5, kind: input, shape index: {}]   ;;  %s3397_s6 = inlined_call_operand.vmem [shape: f32[1,128], index: 6, kind: input, shape index: {}]   ;;  %s3398_s7 = inlined_call_operand.vmem [shape: f32[2,256,128], index: 7, kind: output, shape index: {}]  }
   0x1 LB: > { %s2012_s25 = sadd.s32 4294967295, %s2319_s24   ;;  %p2016_p0 = scmp.ge.s32.totalorder %s2319_s24, 1  ;;  %s2319_s24 = sphi %s2362_s24, %s17_s24  }
   0x2   : > { %p237_p1 = scmp.lt.s32.totalorder %s2319_s24, 3 }
   0x4   : > { %p238_p2 = pnand %p2016_p0, %p237_p1 }
   0x5   : > { %p269_p3 = scmp.lt.s32.totalorder (!%p238_p2), %s2012_s25, 1 }
   0x6   : > { %241 = sbr.rel (%p238_p2) target bundleno = 612 (0x264), region = 48 }
   0xb   : > { %v326_v0 = vld [vmem:[%s3392_s1 + $0x78] sm:$0xff]  ;;  %v325_v1 = vld [vmem:[%s3392_s1 + $0x70] sm:$0xff]  ;;  %v324_v2 = vld [vmem:[%s3392_s1 + $0x68] sm:$0xff]  ;;  %s3400_s25 = smov (!%p269_p3, %s2012_s25), 1  ;;  %v2321_v50 = vmov 0.0  }
   0xc   : > { %2133 = vmatprep.subr.mxu0 %v326_v0  ;;  %v323_v3 = vld [vmem:[%s3392_s1 + $0x60] sm:$0xff]  ;;  %s2035_s11 = sshll.u32 %s3400_s25, 8  ;;  %v322_v4 = vld [vmem:[%s3392_s1 + $0x58] sm:$0xff]  ;;  %v321_v6 = vld [vmem:[%s3392_s1 + $0x50] sm:$0xff]  ;;  %591 = vst [vmem:[#allocation2] sm:$0xff] %v2321_v50 }
   0xd   : > { %2134 = vmatpush3.msra.mxu0 %v326_v0  ;;  %s2390_s14 = scalar_lea.vmem %s3391_s0, %s2035_s11  ;;  %v320_v7 = vld [vmem:[%s3392_s1 + $0x48] sm:$0xff]  ;;  %v319_v8 = vld [vmem:[%s3392_s1 + $0x40] sm:$0xff]  ;;  %v318_v9 = vld [vmem:[%s3392_s1 + $0x38] sm:$0xff]  ;;  %592 = vst [vmem:[#allocation2 + $0x8] sm:$0xff] %v2321_v50  ;;  %s3323_s18 = scalar_lea.vmem %s3398_s7, %s2035_s11 }
   0xe   : > { %2135 = vmatprep.subr.mxu0 %v325_v1  ;;  %v279_v5 = vld [vmem:[%s2390_s14] sm:$0xff]  ;;  %v317_v10 = vld [vmem:[%s3392_s1 + $0x30] sm:$0xff]  ;;  %v316_v11 = vld [vmem:[%s3392_s1 + $0x28] sm:$0xff]  ;;  %593 = vst [vmem:[#allocation2 + $0x10] sm:$0xff] %v2321_v50 }
   0xf   : > { %2136 = vmatpush3.msra.mxu0 %v325_v1  ;;  %2165 = vmatprep.mubr.f32.mxu0 %v279_v5  ;;  %v315_v12 = vld [vmem:[%s3392_s1 + $0x20] sm:$0xff]  ;;  %v314_v13 = vld [vmem:[%s3392_s1 + $0x18] sm:$0xff]  ;;  %v313_v14 = vld [vmem:[%s3392_s1 + $0x10] sm:$0xff]  ;;  %594 = vst [vmem:[#allocation2 + $0x18] sm:$0xff] %v2321_v50 }
  0x10   : > { %2137 = vmatprep.subr.mxu0 %v324_v2  ;;  %v312_v15 = vld [vmem:[%s3392_s1 + $0x8] sm:$0xff]  ;;  %v311_v16 = vld [vmem:[%s3392_s1] sm:$0xff]  ;;  %v281_v18 = vld [vmem:[%s2390_s14 + $0x10] sm:$0xff]  ;;  %595 = vst [vmem:[#allocation2 + $0x20] sm:$0xff] %v2321_v50 }
  0x11   : > { %2138 = vmatpush3.msra.mxu0 %v324_v2  ;;  %v280_v17 = vld [vmem:[%s2390_s14 + $0x8] sm:$0xff]  ;;  %v282_v19 = vld [vmem:[%s2390_s14 + $0x18] sm:$0xff]  ;;  %v283_v20 = vld [vmem:[%s2390_s14 + $0x20] sm:$0xff]  ;;  %598 = vst [vmem:[#allocation2 + $0x38] sm:$0xff] %v2321_v50 }
  0x12   : > { %2139 = vmatprep.subr.mxu0 %v323_v3  ;;  %v284_v21 = vld [vmem:[%s2390_s14 + $0x28] sm:$0xff]  ;;  %v285_v22 = vld [vmem:[%s2390_s14 + $0x30] sm:$0xff]  ;;  %v286_v23 = vld [vmem:[%s2390_s14 + $0x38] sm:$0xff]  ;;  %599 = vst [vmem:[#allocation2 + $0x40] sm:$0xff] %v2321_v50 }
  0x13   : > { %2140 = vmatpush3.msra.mxu0 %v323_v3  ;;  %v287_v24 = vld [vmem:[%s2390_s14 + $0x40] sm:$0xff]  ;;  %v288_v25 = vld [vmem:[%s2390_s14 + $0x48] sm:$0xff]  ;;  %v289_v26 = vld [vmem:[%s2390_s14 + $0x50] sm:$0xff]  ;;  %602 = vst [vmem:[#allocation2 + $0x58] sm:$0xff] %v2321_v50 }
  0x14   : > { %2141 = vmatprep.subr.mxu0 %v322_v4  ;;  %v290_v27 = vld [vmem:[%s2390_s14 + $0x58] sm:$0xff]  ;;  %v291_v28 = vld [vmem:[%s2390_s14 + $0x60] sm:$0xff]  ;;  %v292_v29 = vld [vmem:[%s2390_s14 + $0x68] sm:$0xff]  ;;  %603 = vst [vmem:[#allocation2 + $0x60] sm:$0xff] %v2321_v50 }
  0x15   : > { %2142 = vmatpush3.msra.mxu0 %v322_v4  ;;  %v293_v30 = vld [vmem:[%s2390_s14 + $0x70] sm:$0xff]  ;;  %v294_v31 = vld [vmem:[%s2390_s14 + $0x78] sm:$0xff]  ;;  %v295_v32 = vld [vmem:[%s2390_s14 + $0x80] sm:$0xff]  ;;  %606 = vst [vmem:[#allocation2 + $0x78] sm:$0xff] %v2321_v50 }
  0x16   : > { %2143 = vmatprep.subr.mxu0 %v321_v6  ;;  %v296_v33 = vld [vmem:[%s2390_s14 + $0x88] sm:$0xff]  ;;  %v297_v34 = vld [vmem:[%s2390_s14 + $0x90] sm:$0xff]  ;;  %v298_v35 = vld [vmem:[%s2390_s14 + $0x98] sm:$0xff]  ;;  %607 = vst [vmem:[#allocation2 + $0x80] sm:$0xff] %v2321_v50 }
  0x17   : > { %2144 = vmatpush3.msra.mxu0 %v321_v6  ;;  %v299_v36 = vld [vmem:[%s2390_s14 + $0xa0] sm:$0xff]  ;;  %v300_v37 = vld [vmem:[%s2390_s14 + $0xa8] sm:$0xff]  ;;  %v301_v38 = vld [vmem:[%s2390_s14 + $0xb0] sm:$0xff]  ;;  %610 = vst [vmem:[#allocation2 + $0x98] sm:$0xff] %v2321_v50 }
  0x18   : > { %2145 = vmatprep.subr.mxu0 %v320_v7  ;;  %v302_v39 = vld [vmem:[%s2390_s14 + $0xb8] sm:$0xff]  ;;  %v303_v40 = vld [vmem:[%s2390_s14 + $0xc0] sm:$0xff]  ;;  %v304_v41 = vld [vmem:[%s2390_s14 + $0xc8] sm:$0xff]  ;;  %611 = vst [vmem:[#allocation2 + $0xa0] sm:$0xff] %v2321_v50 }
  0x19   : > { %2146 = vmatpush3.msra.mxu0 %v320_v7  ;;  %v305_v42 = vld [vmem:[%s2390_s14 + $0xd0] sm:$0xff]  ;;  %v306_v43 = vld [vmem:[%s2390_s14 + $0xd8] sm:$0xff]  ;;  %v307_v44 = vld [vmem:[%s2390_s14 + $0xe0] sm:$0xff]  ;;  %614 = vst [vmem:[#allocation2 + $0xb8] sm:$0xff] %v2321_v50 }
  0x1a   : > { %2147 = vmatprep.subr.mxu0 %v319_v8  ;;  %v308_v45 = vld [vmem:[%s2390_s14 + $0xe8] sm:$0xff]  ;;  %v309_v46 = vld [vmem:[%s2390_s14 + $0xf0] sm:$0xff]  ;;  %v310_v47 = vld [vmem:[%s2390_s14 + $0xf8] sm:$0xff]  ;;  %615 = vst [vmem:[#allocation2 + $0xc0] sm:$0xff] %v2321_v50 }
  0x1b   : > { %2148 = vmatpush3.msra.mxu0 %v319_v8  ;;  %v1660_v48 = vld [vmem:[%s3396_s5 + $0x78] sm:$0xff]  ;;  %v1659_v49 = vld [vmem:[%s3396_s5 + $0x70] sm:$0xff]  ;;  %618 = vst [vmem:[#allocation2 + $0xd8] sm:$0xff] %v2321_v50  ;;  %619 = vst [vmem:[#allocation2 + $0xe0] sm:$0xff] %v2321_v50 }
  0x1c   : > { %2149 = vmatprep.subr.mxu0 %v318_v9  ;;  %2213 = vmatprep.subr.mxu1 %v1660_v48  ;;  %622 = vst [vmem:[#allocation2 + $0xf8] sm:$0xff] %v2321_v50  ;;  %623 = vst [vmem:[#allocation2 + $0x100] sm:$0xff] %v2321_v50  ;;  %v1658_v51 = vld [vmem:[%s3396_s5 + $0x68] sm:$0xff]  ;;  %v1657_v52 = vld [vmem:[%s3396_s5 + $0x60] sm:$0xff] }
  0x1d   : > { %2150 = vmatpush3.msra.mxu0 %v318_v9  ;;  %2214 = vmatpush3.msra.mxu1 %v1660_v48  ;;  %626 = vst [vmem:[#allocation2 + $0x118] sm:$0xff] %v2321_v50  ;;  %627 = vst [vmem:[#allocation2 + $0x120] sm:$0xff] %v2321_v50  ;;  %v1656_v53 = vld [vmem:[%s3396_s5 + $0x58] sm:$0xff]  ;;  %v1655_v54 = vld [vmem:[%s3396_s5 + $0x50] sm:$0xff] }
  0x1e   : > { %2151 = vmatprep.subr.mxu0 %v317_v10  ;;  %2215 = vmatprep.subr.mxu1 %v1659_v49  ;;  %630 = vst [vmem:[#allocation2 + $0x138] sm:$0xff] %v2321_v50  ;;  %631 = vst [vmem:[#allocation2 + $0x140] sm:$0xff] %v2321_v50  ;;  %v1654_v55 = vld [vmem:[%s3396_s5 + $0x48] sm:$0xff]  ;;  %v1653_v56 = vld [vmem:[%s3396_s5 + $0x40] sm:$0xff] }
  0x1f   : > { %2152 = vmatpush3.msra.mxu0 %v317_v10  ;;  %634 = vst [vmem:[#allocation2 + $0x158] sm:$0xff] %v2321_v50  ;;  %635 = vst [vmem:[#allocation2 + $0x160] sm:$0xff] %v2321_v50  ;;  %2216 = vmatpush3.msra.mxu1 %v1659_v49  ;;  %v1652_v57 = vld [vmem:[%s3396_s5 + $0x38] sm:$0xff]  ;;  %v1651_v58 = vld [vmem:[%s3396_s5 + $0x30] sm:$0xff] }
  0x20   : > { %2153 = vmatprep.subr.mxu0 %v316_v11  ;;  %638 = vst [vmem:[#allocation2 + $0x178] sm:$0xff] %v2321_v50  ;;  %639 = vst [vmem:[#allocation2 + $0x180] sm:$0xff] %v2321_v50  ;;  %2217 = vmatprep.subr.mxu1 %v1658_v51  ;;  %v1650_v59 = vld [vmem:[%s3396_s5 + $0x28] sm:$0xff]  ;;  %v1649_v60 = vld [vmem:[%s3396_s5 + $0x20] sm:$0xff] }
  0x21   : > { %2154 = vmatpush3.msra.mxu0 %v316_v11  ;;  %642 = vst [vmem:[#allocation2 + $0x198] sm:$0xff] %v2321_v50  ;;  %643 = vst [vmem:[#allocation2 + $0x1a0] sm:$0xff] %v2321_v50  ;;  %2218 = vmatpush3.msra.mxu1 %v1658_v51  ;;  %v1648_v61 = vld [vmem:[%s3396_s5 + $0x18] sm:$0xff]  ;;  %v1647_v62 = vld [vmem:[%s3396_s5 + $0x10] sm:$0xff] }
  0x22   : > { %2155 = vmatprep.subr.mxu0 %v315_v12  ;;  %646 = vst [vmem:[#allocation2 + $0x1b8] sm:$0xff] %v2321_v50  ;;  %647 = vst [vmem:[#allocation2 + $0x1c0] sm:$0xff] %v2321_v50  ;;  %2219 = vmatprep.subr.mxu1 %v1657_v52  ;;  %v1646_v63 = vld [vmem:[%s3396_s5 + $0x8] sm:$0xff]  ;;  %v1645_v0 = vld [vmem:[%s3396_s5] sm:$0xff] }
  0x23   : > { %2156 = vmatpush3.msra.mxu0 %v315_v12  ;;  %650 = vst [vmem:[#allocation2 + $0x1d8] sm:$0xff] %v2321_v50  ;;  %651 = vst [vmem:[#allocation2 + $0x1e0] sm:$0xff] %v2321_v50  ;;  %2220 = vmatpush3.msra.mxu1 %v1657_v52  ;;  %v2511_v1 = vld [vmem:[%s3393_s2] ss:$0 sm:$0xff]  ;;  %v696_v2 = vld [vmem:[#allocation2 + $0x7] sm:$0xff] }
  0x24   : > { %2157 = vmatprep.subr.mxu0 %v314_v13  ;;  %654 = vst [vmem:[#allocation2 + $0x1f8] sm:$0xff] %v2321_v50  ;;  %655 = vst [vmem:[#allocation2 + $0x200] sm:$0xff] %v2321_v50  ;;  %2221 = vmatprep.subr.mxu1 %v1656_v53  ;;  %v2516_v3 = vld [vmem:[%s3394_s3] ss:$0 sm:$0xff]  ;;  %v697_v5 = vld [vmem:[#allocation2 + $0xf] sm:$0xff] }
  0x25   : > { %2158 = vmatpush3.msra.mxu0 %v314_v13  ;;  %658 = vst [vmem:[#allocation2 + $0x218] sm:$0xff] %v2321_v50  ;;  %659 = vst [vmem:[#allocation2 + $0x220] sm:$0xff] %v2321_v50  ;;  %2222 = vmatpush3.msra.mxu1 %v1656_v53  ;;  %v2522_v7 = vld [vmem:[%s3394_s3 + $0x1] ss:$0 sm:$0xff]  ;;  %v733_v9 = vmul.f32 %v2516_v3, %v696_v2  ;;  %v898_v13 = vld [vmem:[#allocation2 + $0x9] sm:$0xff] }
  0x26   : > { %2159 = vmatprep.subr.mxu0 %v313_v14  ;;  %660 = vst [vmem:[#allocation2 + $0x228] sm:$0xff] %v2321_v50  ;;  %661 = vst [vmem:[#allocation2 + $0x230] sm:$0xff] %v2321_v50  ;;  %2223 = vmatprep.subr.mxu1 %v1655_v54  ;;  %v834_v10 = vmul.f32 0.0, %v2522_v7 }
  0x27   : > { %2160 = vmatpush3.msra.mxu0 %v313_v14  ;;  %662 = vst [vmem:[#allocation2 + $0x238] sm:$0xff] %v2321_v50  ;;  %2224 = vmatpush3.msra.mxu1 %v1655_v54  ;;  %v2530_v14 = vld [vmem:[%s3394_s3 + $0x2] ss:$0 sm:$0xff] }
  0x28   : > { %2161 = vmatprep.subr.mxu0 %v312_v15  ;;  %2225 = vmatprep.subr.mxu1 %v1654_v55 }
  0x29   : > { %2162 = vmatpush3.msra.mxu0 %v312_v15  ;;  %2226 = vmatpush3.msra.mxu1 %v1654_v55  ;;  %v734_v15 = vmul.f32 %v2516_v3, %v697_v5 }
  0x2a   : > { %2163 = vmatprep.subr.mxu0 %v311_v16  ;;  %2227 = vmatprep.subr.mxu1 %v1653_v56 }
  0x2b   : > { %2164 = vmatpush3.msra.mxu0 %v311_v16  ;;  %2228 = vmatpush3.msra.mxu1 %v1653_v56 }
  0x2c   : > { %2166 = vmatmul.mubr.f32.vlgmr.msra.gmra.mxu0 %v280_v17  ;;  %2229 = vmatprep.subr.mxu1 %v1652_v57  ;;  %v899_v17 = vld [vmem:[#allocation2 + $0x11] sm:$0xff] }
  0x2d   : > { %2168 = vmatprep.mubr.f32.mxu0 %v281_v18  ;;  %2230 = vmatpush3.msra.mxu1 %v1652_v57 }
  0x2e   : > { %2231 = vmatprep.subr.mxu1 %v1651_v58 }
  0x2f   : > { %2232 = vmatpush3.msra.mxu1 %v1651_v58 }
  0x30   : > { %2169 = vmatmul.mubr.f32.gmra.mxu0 %v282_v19  ;;  %2233 = vmatprep.subr.mxu1 %v1650_v59 }
  0x31   : > { %2171 = vmatprep.mubr.f32.mxu0 %v283_v20  ;;  %2234 = vmatpush3.msra.mxu1 %v1650_v59 }
  0x32   : > { %2235 = vmatprep.subr.mxu1 %v1649_v60 }
  0x33   : > { %2236 = vmatpush3.msra.mxu1 %v1649_v60 }
  0x34   : > { %2172 = vmatmul.mubr.f32.gmra.mxu0 %v284_v21  ;;  %2237 = vmatprep.subr.mxu1 %v1648_v61  ;;  %v866_v21 = vadd.f32 %v834_v10, %v733_v9 }
  0x35   : > { %2174 = vmatprep.mubr.f32.mxu0 %v285_v22  ;;  %2238 = vmatpush3.msra.mxu1 %v1648_v61  ;;  %v935_v22 = vmul.f32 %v2530_v14, %v898_v13 }
  0x36   : > { %2239 = vmatprep.subr.mxu1 %v1647_v62 }
  0x37   : > { %2240 = vmatpush3.msra.mxu1 %v1647_v62 }
  0x38   : > { %2175 = vmatmul.mubr.f32.gmra.mxu0 %v286_v23  ;;  %2241 = vmatprep.subr.mxu1 %v1646_v63 }
  0x39   : > { %2177 = vmatprep.mubr.f32.mxu0 %v287_v24  ;;  %2242 = vmatpush3.msra.mxu1 %v1646_v63  ;;  %v2597_v63 = vld [vmem:[%s3394_s3 + $0x8] ss:$0 sm:$0xff] }
  0x3a   : > { %2243 = vmatprep.subr.mxu1 %v1645_v0 }
  0x3b   : > { %2244 = vmatpush3.msra.mxu1 %v1645_v0 }
  0x3c   : > { %2178 = vmatmul.mubr.f32.gmra.mxu0 %v288_v25  ;;  %v867_v25 = vadd.f32 %v834_v10, %v734_v15  ;;  %v2611_v10 = vld [vmem:[%s3394_s3 + $0x6] ss:$0 sm:$0xff] }
  0x3d   : > { %2180 = vmatprep.mubr.f32.mxu0 %v289_v26  ;;  %v936_v26 = vmul.f32 %v2530_v14, %v899_v17 }
  0x40   : > { %2181 = vmatmul.mubr.f32.gmra.mxu0 %v290_v27 }
  0x41   : > { %2183 = vmatprep.mubr.f32.mxu0 %v291_v28 }
  0x44   : > { %2184 = vmatmul.mubr.f32.gmra.mxu0 %v292_v29 }
  0x45   : > { %2186 = vmatprep.mubr.f32.mxu0 %v293_v30  ;;  %v2541_v30 = vld [vmem:[%s3394_s3 + $0x4] ss:$0 sm:$0xff] }
  0x48   : > { %2187 = vmatmul.mubr.f32.gmra.mxu0 %v294_v31 }
  0x49   : > { %2189 = vmatprep.mubr.f32.mxu0 %v295_v32  ;;  %v2546_v32 = vld [vmem:[%s3394_s3 + $0x7] ss:$0 sm:$0xff] }
  0x4c   : > { %2190 = vmatmul.mubr.f32.gmra.mxu0 %v296_v33 }
  0x4d   : > { %2192 = vmatprep.mubr.f32.mxu0 %v297_v34 }
  0x50   : > { %2193 = vmatmul.mubr.f32.gmra.mxu0 %v298_v35  ;;  %v967_v35 = vadd.f32 %v935_v22, %v866_v21 }
  0x51   : > { %2195 = vmatprep.mubr.f32.mxu0 %v299_v36  ;;  %v968_v36 = vadd.f32 %v936_v26, %v867_v25 }
  0x54   : > { %2196 = vmatmul.mubr.f32.gmra.mxu0 %v300_v37 }
  0x55   : > { %2198 = vmatprep.mubr.f32.mxu0 %v301_v38  ;;  %v2554_v38 = vld [vmem:[%s3394_s3 + $0x3] ss:$0 sm:$0xff] }
  0x58   : > { %2199 = vmatmul.mubr.f32.gmra.mxu0 %v302_v39 }
  0x59   : > { %2201 = vmatprep.mubr.f32.mxu0 %v303_v40  ;;  %v2560_v40 = vld [vmem:[%s3394_s3 + $0x5] ss:$0 sm:$0xff] }
  0x5c   : > { %2202 = vmatmul.mubr.f32.gmra.mxu0 %v304_v41 }
  0x5d   : > { %2204 = vmatprep.mubr.f32.mxu0 %v305_v42 }
  0x60   : > { %2205 = vmatmul.mubr.f32.gmra.mxu0 %v306_v43 }
  0x61   : > { %2207 = vmatprep.mubr.f32.mxu0 %v307_v44 }
  0x64   : > { %2208 = vmatmul.mubr.f32.gmra.mxu0 %v308_v45 }
  0x65   : > { %2210 = vmatprep.mubr.f32.mxu0 %v309_v46 }
  0x68   : > { %2211 = vmatmul.mubr.f32.gmra.mxu0 %v310_v47 }
  0xec   : > { %v2167_v4 = vpop.f32.mrf.mxu0 }
  0xed   : > { %v406_v6 = vadd.f32 %v2167_v4, %v2511_v1 }
  0xee   : > { %v400_v8 = vpop.f32.mrf.mxu0 }
  0xef   : > { %v560_v11 = vmax.f32 %v406_v6, 0.0  ;;  %v401_v12 = vadd.f32 %v2511_v1, %v400_v8 }
  0xf0   : > { %v2170_v16 = vpop.f32.mrf.mxu0 }
  0xf1   : > { %665 = vst [vmem:[#allocation2 + $0x30] sm:$0xff] %v560_v11  ;;  %v559_v18 = vmax.f32 %v401_v12, 0.0  ;;  %v416_v19 = vadd.f32 %v2170_v16, %v2511_v1  ;;  %v1138_v41 = vmul.f32 %v2541_v30, %v560_v11  ;;  %v837_v44 = vmul.f32 %v2522_v7, %v560_v11 }
  0xf2   : > { %v410_v20 = vpop.f32.mrf.mxu0 }
  0xf3   : > { %664 = vst [vmem:[#allocation2 + $0x28] sm:$0xff] %v559_v18  ;;  %v562_v23 = vmax.f32 %v416_v19, 0.0  ;;  %v411_v24 = vadd.f32 %v2511_v1, %v410_v20  ;;  %v1137_v39 = vmul.f32 %v2541_v30, %v559_v18  ;;  %v836_v43 = vmul.f32 %v2522_v7, %v559_v18 }
  0xf4   : > { %v2173_v27 = vpop.f32.mrf.mxu0 }
  0xf5   : > { %667 = vst [vmem:[#allocation2 + $0x50] sm:$0xff] %v562_v23  ;;  %v561_v28 = vmax.f32 %v411_v24, 0.0  ;;  %v426_v29 = vadd.f32 %v2173_v27, %v2511_v1  ;;  %v2570_v47 = vmul.f32 %v2546_v32, %v562_v23  ;;  %v2573_v48 = vmul.f32 %v2541_v30, %v562_v23 }
  0xf6   : > { %v420_v31 = vpop.f32.mrf.mxu0  ;;  %v2585_v56 = vmul.f32 %v2522_v7, %v562_v23 }
  0xf7   : > { %666 = vst [vmem:[#allocation2 + $0x48] sm:$0xff] %v561_v28  ;;  %v2548_v33 = vmax.f32 %v426_v29, 0.0  ;;  %v421_v34 = vadd.f32 %v2511_v1, %v420_v31  ;;  %v2576_v52 = vmul.f32 %v2546_v32, %v561_v28  ;;  %v2579_v54 = vmul.f32 %v2541_v30, %v561_v28 }
  0xf8   : > { %v2176_v37 = vpop.f32.mrf.mxu0  ;;  %v1202_v42 = vld [vmem:[#allocation2 + $0x31] sm:$0xff]  ;;  %v2582_v55 = vmul.f32 %v2522_v7, %v561_v28 }
  0xf9   : > { %669 = vst [vmem:[#allocation2 + $0x70] sm:$0xff] %v2548_v33  ;;  %v2566_v45 = vmax.f32 %v421_v34, 0.0  ;;  %v436_v46 = vadd.f32 %v2176_v37, %v2511_v1  ;;  %v1239_v60 = vmul.f32 %v2560_v40, %v1202_v42  ;;  %v938_v5 = vmul.f32 %v2530_v14, %v1202_v42 }
  0xfa   : > { %v430_v49 = vpop.f32.mrf.mxu0  ;;  %v999_v50 = vld [vmem:[#allocation2 + $0x27] sm:$0xff]  ;;  %v1000_v53 = vld [vmem:[#allocation2 + $0x2f] sm:$0xff] }
  0xfb   : > { %v1201_v51 = vld [vmem:[#allocation2 + $0x29] sm:$0xff]  ;;  %668 = vst [vmem:[#allocation2 + $0x68] sm:$0xff] %v2566_v45  ;;  %v2588_v57 = vmax.f32 %v436_v46, 0.0  ;;  %v431_v58 = vadd.f32 %v2511_v1, %v430_v49  ;;  %v1036_v59 = vmul.f32 %v2554_v38, %v999_v50  ;;  %v1037_v0 = vmul.f32 %v2554_v38, %v1000_v53 }
  0xfc   : > { %v2179_v61 = vpop.f32.mrf.mxu0  ;;  %v1238_v62 = vmul.f32 %v2560_v40, %v1201_v51  ;;  %v2600_v2 = vld [vmem:[#allocation2 + $0x51] sm:$0xff]  ;;  %v735_v4 = vmul.f32 %v2516_v3, %v999_v50  ;;  %v937_v11 = vmul.f32 %v2530_v14, %v1201_v51  ;;  %v2616_v17 = vmul.f32 %v2546_v32, %v2566_v45 }
  0xfd   : > { %671 = vst [vmem:[#allocation2 + $0x90] sm:$0xff] %v2588_v57  ;;  %v2605_v6 = vmax.f32 %v431_v58, 0.0  ;;  %v446_v8 = vadd.f32 %v2179_v61, %v2511_v1  ;;  %v1068_v9 = vadd.f32 %v1036_v59, %v967_v35  ;;  %v1069_v15 = vadd.f32 %v1037_v0, %v968_v36 }
  0xfe   : > { %v440_v12 = vpop.f32.mrf.mxu0  ;;  %v1303_v13 = vld [vmem:[#allocation2 + $0x47] sm:$0xff]  ;;  %v868_v16 = vadd.f32 %v836_v43, %v735_v4  ;;  %v736_v18 = vmul.f32 %v2516_v3, %v1000_v53  ;;  %v2623_v22 = vld [vmem:[#allocation2 + $0x4f] sm:$0xff]  ;;  %v1543_v23 = vmul.f32 %v2597_v63, %v2600_v2  ;;  %v1241_v28 = vmul.f32 %v2560_v40, %v2600_v2 }
  0xff   : > { %670 = vst [vmem:[#allocation2 + $0x88] sm:$0xff] %v2605_v6  ;;  %v2620_v19 = vmax.f32 %v446_v8, 0.0  ;;  %v441_v20 = vadd.f32 %v2511_v1, %v440_v12  ;;  %v1169_v21 = vadd.f32 %v1137_v39, %v1068_v9  ;;  %v1340_v25 = vmul.f32 %v2611_v10, %v1303_v13  ;;  %v1505_v35 = vld [vmem:[#allocation2 + $0x49] sm:$0xff]  ;;  %v2658_v12 = vld [vmem:[%s3395_s4] ss:$0 sm:$0xff] }
 0x100   : > { %v2182_v24 = vpop.f32.mrf.mxu0  ;;  %v1170_v26 = vadd.f32 %v1138_v41, %v1069_v15  ;;  %v969_v27 = vadd.f32 %v937_v11, %v868_v16  ;;  %v1038_v36 = vmul.f32 %v2554_v38, %v1303_v13  ;;  %v1341_v42 = vmul.f32 %v2611_v10, %v2623_v22 }
 0x101   : > { %673 = vst [vmem:[#allocation2 + $0xb0] sm:$0xff] %v2620_v19  ;;  %v2631_v29 = vmax.f32 %v441_v20, 0.0  ;;  %v456_v31 = vadd.f32 %v2182_v24, %v2511_v1  ;;  %v1270_v34 = vadd.f32 %v1238_v62, %v1169_v21  ;;  %v869_v41 = vadd.f32 %v837_v44, %v736_v18 }
 0x102   : > { %v450_v37 = vpop.f32.mrf.mxu0  ;;  %v1271_v39 = vadd.f32 %v1239_v60, %v1170_v26  ;;  %v1039_v43 = vmul.f32 %v2554_v38, %v2623_v22  ;;  %v1070_v51 = vadd.f32 %v1038_v36, %v969_v27  ;;  %v2643_v53 = vld [vmem:[#allocation2 + $0x67] sm:$0xff]  ;;  %v2645_v58 = vld [vmem:[#allocation2 + $0x6f] sm:$0xff]  ;;  %v1542_v60 = vmul.f32 %v2597_v63, %v1505_v35 }
 0x103   : > { %672 = vst [vmem:[#allocation2 + $0xa8] sm:$0xff] %v2631_v29  ;;  %v2640_v46 = vmax.f32 %v456_v31, 0.0  ;;  %v451_v49 = vadd.f32 %v2511_v1, %v450_v37  ;;  %v1372_v50 = vadd.f32 %v1340_v25, %v1270_v34  ;;  %v1240_v44 = vmul.f32 %v2560_v40, %v1505_v35  ;;  %v2669_v26 = vld [vmem:[#allocation2 + $0x69] sm:$0xff] }
 0x104   : > { %v2185_v59 = vpop.f32.mrf.mxu0  ;;  %v1373_v61 = vadd.f32 %v1341_v42, %v1271_v39  ;;  %v970_v62 = vadd.f32 %v938_v5, %v869_v41  ;;  %v1171_v9 = vadd.f32 %v2579_v54, %v1070_v51  ;;  %v1342_v5 = vmul.f32 %v2611_v10, %v2643_v53  ;;  %v2679_v42 = vld [vmem:[#allocation2 + $0x71] sm:$0xff] }
 0x105   : > { %675 = vst [vmem:[#allocation2 + $0xd0] sm:$0xff] %v2640_v46  ;;  %v2650_v0 = vmax.f32 %v451_v49, 0.0  ;;  %v466_v4 = vadd.f32 %v2185_v59, %v2511_v1  ;;  %v1473_v8 = vadd.f32 %v2576_v52, %v1372_v50  ;;  %v1343_v18 = vmul.f32 %v2611_v10, %v2645_v58 }
 0x106   : > { %v460_v11 = vpop.f32.mrf.mxu0  ;;  %v1474_v15 = vadd.f32 %v2570_v47, %v1373_v61  ;;  %v1071_v16 = vadd.f32 %v1039_v43, %v970_v62  ;;  %v1272_v21 = vadd.f32 %v1240_v44, %v1171_v9  ;;  %v737_v27 = vmul.f32 %v2516_v3, %v1303_v13 }
 0x107   : > { %674 = vst [vmem:[#allocation2 + $0xc8] sm:$0xff] %v2650_v0  ;;  %v2666_v52 = vmax.f32 %v466_v4, 0.0  ;;  %v461_v54 = vadd.f32 %v2511_v1, %v460_v11  ;;  %v1574_v20 = vadd.f32 %v1542_v60, %v1473_v8  ;;  %v939_v31 = vmul.f32 %v2530_v14, %v1505_v35 }
 0x108   : > { %v2188_v24 = vpop.f32.mrf.mxu0  ;;  %v1575_v25 = vadd.f32 %v1543_v23, %v1474_v15  ;;  %v1172_v47 = vadd.f32 %v2573_v48, %v1071_v16  ;;  %v1374_v39 = vadd.f32 %v1342_v5, %v1272_v21  ;;  %v870_v48 = vadd.f32 %v2582_v55, %v737_v27 }
 0x109   : > { %677 = vst [vmem:[#allocation2 + $0xf0] sm:$0xff] %v2666_v52  ;;  %v2675_v34 = vmax.f32 %v461_v54, 0.0  ;;  %v476_v36 = vadd.f32 %v2188_v24, %v2511_v1  ;;  %v1613_v37 = vadd.f32 %v2658_v12, %v1574_v20  ;;  %v1040_v13 = vmul.f32 %v2554_v38, %v2643_v53  ;;  %v2712_v20 = vld [vmem:[#allocation2 + $0x87] sm:$0xff] }
 0x10a   : > { %v470_v23 = vpop.f32.mrf.mxu0  ;;  %v1614_v41 = vadd.f32 %v2658_v12, %v1575_v25  ;;  %v1273_v43 = vadd.f32 %v1241_v28, %v1172_v47  ;;  %v1475_v50 = vadd.f32 %v2616_v17, %v1374_v39  ;;  %v1544_v51 = vmul.f32 %v2597_v63, %v2669_v26 }
 0x10b   : > { %676 = vst [vmem:[#allocation2 + $0xe8] sm:$0xff] %v2675_v34  ;;  %v2686_v35 = vmax.f32 %v476_v36, 0.0  ;;  %v471_v49 = vadd.f32 %v2511_v1, %v470_v23  ;;  %2245 = vmatprep.mubr.f32.mxu1 %v1613_v37  ;;  %v1444_v55 = vmul.f32 %v2546_v32, %v2548_v33  ;;  %v1545_v60 = vmul.f32 %v2597_v63, %v2679_v42  ;;  %v2724_v37 = vld [vmem:[#allocation2 + $0x89] sm:$0xff] }
 0x10c   : > { %v2191_v59 = vpop.f32.mrf.mxu0  ;;  %2246 = vmatmul.mubr.f32.vlgmr.msra.gmra.mxu1 %v1614_v41  ;;  %v1375_v28 = vadd.f32 %v1343_v18, %v1273_v43  ;;  %v971_v61 = vadd.f32 %v939_v31, %v870_v48  ;;  %v1576_v17 = vadd.f32 %v1544_v51, %v1475_v50  ;;  %v1141_v4 = vmul.f32 %v2541_v30, %v2566_v45 }
 0x10d   : > { %679 = vst [vmem:[#allocation2 + $0x110] sm:$0xff] %v2686_v35  ;;  %v2697_v44 = vmax.f32 %v471_v49, 0.0  ;;  %v2700_v62 = vadd.f32 %v2191_v59, %v2511_v1  ;;  %v1242_v15 = vmul.f32 %v2560_v40, %v2669_v26  ;;  %v738_v5 = vmul.f32 %v2516_v3, %v2623_v22 }
 0x10e   : > { %v480_v8 = vpop.f32.mrf.mxu0  ;;  %v1476_v9 = vadd.f32 %v1444_v55, %v1375_v28  ;;  %v1072_v11 = vadd.f32 %v1040_v13, %v971_v61  ;;  %v1615_v54 = vadd.f32 %v2658_v12, %v1576_v17  ;;  %v940_v21 = vmul.f32 %v2530_v14, %v2600_v2 }
 0x10f   : > { %678 = vst [vmem:[#allocation2 + $0x108] sm:$0xff] %v2697_v44  ;;  %v576_v16 = vmax.f32 %v2700_v62, 0.0  ;;  %v481_v18 = vadd.f32 %v2511_v1, %v480_v8  ;;  %v871_v27 = vadd.f32 %v2585_v56, %v738_v5  ;;  %v1041_v22 = vmul.f32 %v2554_v38, %v2645_v58 }
 0x110   : > { %v2194_v24 = vpop.f32.mrf.mxu0  ;;  %v1577_v25 = vadd.f32 %v1545_v60, %v1476_v9  ;;  %v1173_v47 = vadd.f32 %v1141_v4, %v1072_v11  ;;  %2248 = vmatprep.mubr.f32.mxu1 %v1615_v54  ;;  %v1142_v2 = vmul.f32 %v2541_v30, %v2548_v33  ;;  %v1344_v41 = vmul.f32 %v2611_v10, %v2712_v20 }
 0x111   : > { %681 = vst [vmem:[#allocation2 + $0x130] sm:$0xff] %v576_v16  ;;  %v2721_v31 = vmax.f32 %v481_v18, 0.0  ;;  %v496_v36 = vadd.f32 %v2194_v24, %v2511_v1  ;;  %v972_v43 = vadd.f32 %v940_v21, %v871_v27  ;;  %v1445_v49 = vmul.f32 %v2546_v32, %v2605_v6 }
 0x112   : > { %v1616_v39 = vadd.f32 %v2658_v12, %v1577_v25  ;;  %v490_v23 = vpop.f32.mrf.mxu0  ;;  %v1274_v56 = vadd.f32 %v1242_v15, %v1173_v47  ;;  %v739_v50 = vmul.f32 %v2516_v3, %v2643_v53  ;;  %v1546_v59 = vmul.f32 %v2597_v63, %v2724_v37  ;;  %v2749_v53 = vld [vmem:[#allocation2 + $0x8f] sm:$0xff] }
 0x113   : > { %680 = vst [vmem:[#allocation2 + $0x128] sm:$0xff] %v2721_v31  ;;  %v2732_v48 = vmax.f32 %v496_v36, 0.0  ;;  %v491_v13 = vadd.f32 %v2511_v1, %v490_v23  ;;  %v1073_v55 = vadd.f32 %v1041_v22, %v972_v43  ;;  %v840_v60 = vmul.f32 %v2522_v7, %v2566_v45  ;;  %v2766_v36 = vld [vmem:[#allocation2 + $0x91] sm:$0xff] }
 0x114   : > { %2249 = vmatmul.mubr.f32.gmra.mxu1 %v1616_v39  ;;  %v1376_v51 = vadd.f32 %v1344_v41, %v1274_v56  ;;  %v2197_v28 = vpop.f32.mrf.mxu0  ;;  %v1243_v4 = vmul.f32 %v2560_v40, %v2679_v42  ;;  %v941_v8 = vmul.f32 %v2530_v14, %v2669_v26  ;;  %v1042_v45 = vmul.f32 %v2554_v38, %v2712_v20 }
 0x115   : > { %683 = vst [vmem:[#allocation2 + $0x150] sm:$0xff] %v2732_v48  ;;  %v2744_v61 = vmax.f32 %v491_v13, 0.0  ;;  %v506_v17 = vadd.f32 %v2197_v28, %v2511_v1  ;;  %v1174_v11 = vadd.f32 %v1142_v2, %v1073_v55  ;;  %v872_v5 = vadd.f32 %v840_v60, %v739_v50  ;;  %v2776_v13 = vld [vmem:[#allocation2 + $0xa7] sm:$0xff] }
 0x116   : > { %v1477_v9 = vadd.f32 %v1445_v49, %v1376_v51  ;;  %v500_v15 = vpop.f32.mrf.mxu0  ;;  %v841_v21 = vmul.f32 %v2522_v7, %v2548_v33  ;;  %v1345_v26 = vmul.f32 %v2611_v10, %v2749_v53  ;;  %v1446_v22 = vmul.f32 %v2546_v32, %v2588_v57 }
 0x117   : > { %682 = vst [vmem:[#allocation2 + $0x148] sm:$0xff] %v2744_v61  ;;  %v2756_v18 = vmax.f32 %v506_v17, 0.0  ;;  %v501_v54 = vadd.f32 %v2511_v1, %v500_v15  ;;  %v1275_v25 = vadd.f32 %v1243_v4, %v1174_v11  ;;  %v973_v47 = vadd.f32 %v941_v8, %v872_v5 }
 0x118   : > { %v1578_v24 = vadd.f32 %v1546_v59, %v1477_v9  ;;  %v2200_v27 = vpop.f32.mrf.mxu0  ;;  %v740_v33 = vmul.f32 %v2516_v3, %v2645_v58  ;;  %v1143_v43 = vmul.f32 %v2541_v30, %v2605_v6  ;;  %v942_v59 = vmul.f32 %v2530_v14, %v2679_v42 }
 0x119   : > { %685 = vst [vmem:[#allocation2 + $0x170] sm:$0xff] %v2756_v18  ;;  %v2768_v2 = vmax.f32 %v501_v54, 0.0  ;;  %v516_v39 = vadd.f32 %v2200_v27, %v2511_v1  ;;  %v1377_v56 = vadd.f32 %v1345_v26, %v1275_v25  ;;  %v1074_v41 = vadd.f32 %v1042_v45, %v973_v47  ;;  %v1511_v45 = vld [vmem:[#allocation2 + $0xa9] sm:$0xff] }
 0x11a   : > { %v1617_v23 = vadd.f32 %v2658_v12, %v1578_v24  ;;  %v510_v49 = vpop.f32.mrf.mxu0  ;;  %v873_v51 = vadd.f32 %v841_v21, %v740_v33  ;;  %v1043_v58 = vmul.f32 %v2554_v38, %v2749_v53  ;;  %v1547_v55 = vmul.f32 %v2597_v63, %v2766_v36  ;;  %v2797_v54 = vld [vmem:[#allocation2 + $0xaf] sm:$0xff] }
 0x11b   : > { %684 = vst [vmem:[#allocation2 + $0x168] sm:$0xff] %v2768_v2  ;;  %v2779_v50 = vmax.f32 %v516_v39, 0.0  ;;  %v1478_v28 = vadd.f32 %v1446_v22, %v1377_v56  ;;  %v1175_v60 = vadd.f32 %v1143_v43, %v1074_v41  ;;  %v1244_v17 = vmul.f32 %v2560_v40, %v2724_v37  ;;  %v2808_v39 = vld [vmem:[#allocation2 + $0xb1] sm:$0xff] }
 0x11c   : > { %2251 = vmatprep.mubr.f32.mxu1 %v1617_v23  ;;  %v1346_v4 = vmul.f32 %v2611_v10, %v2776_v13  ;;  %v974_v8 = vadd.f32 %v942_v59, %v873_v51  ;;  %v511_v42 = vadd.f32 %v2511_v1, %v510_v49  ;;  %v741_v9 = vmul.f32 %v2516_v3, %v2712_v20  ;;  %v2203_v47 = vpop.f32.mrf.mxu0 }
 0x11d   : > { %687 = vst [vmem:[#allocation2 + $0x190] sm:$0xff] %v2779_v50  ;;  %v1579_v11 = vadd.f32 %v1547_v55, %v1478_v28  ;;  %v1276_v15 = vadd.f32 %v1244_v17, %v1175_v60  ;;  %v1447_v5 = vmul.f32 %v2546_v32, %v2631_v29  ;;  %v842_v21 = vmul.f32 %v2522_v7, %v2605_v6  ;;  %v2825_v60 = vld [vmem:[#allocation2 + $0xc7] sm:$0xff] }
 0x11e   : > { %v1075_v24 = vadd.f32 %v1043_v58, %v974_v8  ;;  %v1144_v25 = vmul.f32 %v2541_v30, %v2588_v57  ;;  %v2803_v26 = vmax.f32 %v511_v42, 0.0  ;;  %v943_v20 = vmul.f32 %v2530_v14, %v2724_v37 }
 0x11f   : > { %v1618_v27 = vadd.f32 %v2658_v12, %v1579_v11  ;;  %v1378_v22 = vadd.f32 %v1346_v4, %v1276_v15  ;;  %v874_v33 = vadd.f32 %v842_v21, %v741_v9  ;;  %v1044_v23 = vmul.f32 %v2554_v38, %v2776_v13  ;;  %v2833_v15 = vld [vmem:[#allocation2 + $0xc9] sm:$0xff] }
 0x120   : > { %v1548_v6 = vmul.f32 %v2597_v63, %v1511_v45  ;;  %v1176_v56 = vadd.f32 %v1144_v25, %v1075_v24  ;;  %v1245_v41 = vmul.f32 %v2560_v40, %v2766_v36  ;;  %v1347_v43 = vmul.f32 %v2611_v10, %v2797_v54  ;;  %686 = vst [vmem:[#allocation2 + $0x188] sm:$0xff] %v2803_v26 }
 0x121   : > { %2252 = vmatmul.mubr.f32.gmra.mxu1 %v1618_v27  ;;  %v1479_v37 = vadd.f32 %v1447_v5, %v1378_v22  ;;  %v975_v49 = vadd.f32 %v943_v20, %v874_v33  ;;  %v526_v51 = vadd.f32 %v2203_v47, %v2511_v1  ;;  %v742_v59 = vmul.f32 %v2516_v3, %v2749_v53  ;;  %v520_v53 = vpop.f32.mrf.mxu0 }
 0x122   : > { %v1277_v58 = vadd.f32 %v1245_v41, %v1176_v56  ;;  %v1448_v28 = vmul.f32 %v2546_v32, %v2620_v19  ;;  %v1549_v55 = vmul.f32 %v2597_v63, %v2808_v39  ;;  %v843_v17 = vmul.f32 %v2522_v7, %v2588_v57  ;;  %v2851_v41 = vld [vmem:[#allocation2 + $0xcf] sm:$0xff] }
 0x123   : > { %v1580_v4 = vadd.f32 %v1548_v6, %v1479_v37  ;;  %v1076_v8 = vadd.f32 %v1044_v23, %v975_v49  ;;  %v1145_v42 = vmul.f32 %v2541_v30, %v2631_v29  ;;  %v2831_v9 = vmax.f32 %v526_v51, 0.0 }
 0x124   : > { %v1379_v11 = vadd.f32 %v1347_v43, %v1277_v58  ;;  %v875_v5 = vadd.f32 %v843_v17, %v742_v59  ;;  %v944_v21 = vmul.f32 %v2530_v14, %v2766_v36  ;;  %v1045_v24 = vmul.f32 %v2554_v38, %v2797_v54 }
 0x125   : > { %v1619_v57 = vadd.f32 %v2658_v12, %v1580_v4  ;;  %v1177_v25 = vadd.f32 %v1145_v42, %v1076_v8  ;;  %v1246_v20 = vmul.f32 %v2560_v40, %v1511_v45  ;;  %v1348_v47 = vmul.f32 %v2611_v10, %v2825_v60  ;;  %689 = vst [vmem:[#allocation2 + $0x1b0] sm:$0xff] %v2831_v9 }
 0x126   : > { %v1480_v27 = vadd.f32 %v1448_v28, %v1379_v11  ;;  %v976_v22 = vadd.f32 %v944_v21, %v875_v5  ;;  %v521_v33 = vadd.f32 %v2511_v1, %v520_v53  ;;  %v743_v36 = vmul.f32 %v2516_v3, %v2776_v13  ;;  %v2206_v13 = vpop.f32.mrf.mxu0  ;;  %v2859_v28 = vld [vmem:[#allocation2 + $0xd1] sm:$0xff] }
 0x127   : > { %2254 = vmatprep.mubr.f32.mxu1 %v1619_v57  ;;  %v1278_v23 = vadd.f32 %v1246_v20, %v1177_v25  ;;  %v1449_v6 = vmul.f32 %v2546_v32, %v2650_v0  ;;  %v1550_v56 = vmul.f32 %v2597_v63, %v2833_v15  ;;  %v844_v43 = vmul.f32 %v2522_v7, %v2631_v29  ;;  %v2877_v20 = vld [vmem:[#allocation2 + $0xe7] sm:$0xff] }
 0x128   : > { %v1581_v37 = vadd.f32 %v1549_v55, %v1480_v27  ;;  %v1077_v49 = vadd.f32 %v1045_v24, %v976_v22  ;;  %v1146_v51 = vmul.f32 %v2541_v30, %v2620_v19  ;;  %v2857_v59 = vmax.f32 %v521_v33, 0.0 }
 0x129   : > { %v1380_v58 = vadd.f32 %v1348_v47, %v1278_v23  ;;  %v876_v17 = vadd.f32 %v844_v43, %v743_v36  ;;  %v945_v4 = vmul.f32 %v2530_v14, %v1511_v45  ;;  %v1046_v8 = vmul.f32 %v2554_v38, %v2825_v60 }
 0x12a   : > { %v1620_v42 = vadd.f32 %v2658_v12, %v1581_v37  ;;  %v1178_v29 = vadd.f32 %v1146_v51, %v1077_v49  ;;  %v1247_v55 = vmul.f32 %v2560_v40, %v2808_v39  ;;  %v1349_v53 = vmul.f32 %v2611_v10, %v2851_v41  ;;  %688 = vst [vmem:[#allocation2 + $0x1a8] sm:$0xff] %v2857_v59 }
 0x12b   : > { %v1481_v11 = vadd.f32 %v1449_v6, %v1380_v58  ;;  %v977_v5 = vadd.f32 %v945_v4, %v876_v17  ;;  %v536_v21 = vadd.f32 %v2206_v13, %v2511_v1  ;;  %v744_v45 = vmul.f32 %v2516_v3, %v2797_v54  ;;  %v530_v54 = vpop.f32.mrf.mxu0  ;;  %v2885_v6 = vld [vmem:[#allocation2 + $0xe9] sm:$0xff] }
 0x12c   : > { %2255 = vmatmul.mubr.f32.gmra.mxu1 %v1620_v42  ;;  %v1279_v24 = vadd.f32 %v1247_v55, %v1178_v29  ;;  %v1450_v57 = vmul.f32 %v2546_v32, %v2640_v46  ;;  %v1551_v25 = vmul.f32 %v2597_v63, %v2859_v28  ;;  %v845_v47 = vmul.f32 %v2522_v7, %v2620_v19  ;;  %v2904_v55 = vld [vmem:[#allocation2 + $0xef] sm:$0xff] }
 0x12d   : > { %v1582_v27 = vadd.f32 %v1550_v56, %v1481_v11  ;;  %v1078_v22 = vadd.f32 %v1046_v8, %v977_v5  ;;  %v1147_v33 = vmul.f32 %v2541_v30, %v2650_v0  ;;  %v2883_v36 = vmax.f32 %v536_v21, 0.0 }
 0x12e   : > { %v1381_v23 = vadd.f32 %v1349_v53, %v1279_v24  ;;  %v877_v43 = vadd.f32 %v845_v47, %v744_v45  ;;  %v946_v37 = vmul.f32 %v2530_v14, %v2808_v39  ;;  %v1047_v49 = vmul.f32 %v2554_v38, %v2851_v41 }
 0x12f   : > { %v1621_v19 = vadd.f32 %v2658_v12, %v1582_v27  ;;  %v1179_v56 = vadd.f32 %v1147_v33, %v1078_v22  ;;  %v1248_v51 = vmul.f32 %v2560_v40, %v2833_v15  ;;  %v1350_v13 = vmul.f32 %v2611_v10, %v2877_v20  ;;  %691 = vst [vmem:[#allocation2 + $0x1d0] sm:$0xff] %v2883_v36 }
 0x130   : > { %v1482_v58 = vadd.f32 %v1450_v57, %v1381_v23  ;;  %v978_v17 = vadd.f32 %v946_v37, %v877_v43  ;;  %v531_v4 = vadd.f32 %v2511_v1, %v530_v54  ;;  %v745_v39 = vmul.f32 %v2516_v3, %v2825_v60  ;;  %v2209_v60 = vpop.f32.mrf.mxu0  ;;  %v2912_v57 = vld [vmem:[#allocation2 + $0xf1] sm:$0xff] }
 0x131   : > { %2257 = vmatprep.mubr.f32.mxu1 %v1621_v19  ;;  %v1280_v8 = vadd.f32 %v1248_v51, %v1179_v56  ;;  %v1451_v42 = vmul.f32 %v2546_v32, %v2675_v34  ;;  %v1552_v29 = vmul.f32 %v2597_v63, %v2885_v6  ;;  %v846_v53 = vmul.f32 %v2522_v7, %v2650_v0  ;;  %v2931_v51 = vld [vmem:[#allocation2 + $0x107] sm:$0xff] }
 0x132   : > { %v1583_v11 = vadd.f32 %v1551_v25, %v1482_v58  ;;  %v1079_v5 = vadd.f32 %v1047_v49, %v978_v17  ;;  %v1148_v21 = vmul.f32 %v2541_v30, %v2640_v46  ;;  %v2910_v45 = vmax.f32 %v531_v4, 0.0 }
 0x133   : > { %v1382_v24 = vadd.f32 %v1350_v13, %v1280_v8  ;;  %v878_v47 = vadd.f32 %v846_v53, %v745_v39  ;;  %v947_v27 = vmul.f32 %v2530_v14, %v2833_v15  ;;  %v1048_v22 = vmul.f32 %v2554_v38, %v2877_v20 }
 0x134   : > { %v1622_v0 = vadd.f32 %v2658_v12, %v1583_v11  ;;  %v1180_v25 = vadd.f32 %v1148_v21, %v1079_v5  ;;  %v1249_v33 = vmul.f32 %v2560_v40, %v2859_v28  ;;  %v1351_v54 = vmul.f32 %v2611_v10, %v2904_v55  ;;  %690 = vst [vmem:[#allocation2 + $0x1c8] sm:$0xff] %v2910_v45 }
 0x135   : > { %v1483_v23 = vadd.f32 %v1451_v42, %v1382_v24  ;;  %v979_v43 = vadd.f32 %v947_v27, %v878_v47  ;;  %v546_v37 = vadd.f32 %v2209_v60, %v2511_v1  ;;  %v746_v15 = vmul.f32 %v2516_v3, %v2851_v41  ;;  %v540_v41 = vpop.f32.mrf.mxu0  ;;  %v2939_v42 = vld [vmem:[#allocation2 + $0x109] sm:$0xff] }
 0x136   : > { %2258 = vmatmul.mubr.f32.gmra.mxu1 %v1622_v0  ;;  %v1281_v49 = vadd.f32 %v1249_v33, %v1180_v25  ;;  %v1452_v19 = vmul.f32 %v2546_v32, %v2666_v52  ;;  %v1553_v56 = vmul.f32 %v2597_v63, %v2912_v57  ;;  %v847_v13 = vmul.f32 %v2522_v7, %v2640_v46  ;;  %v2958_v33 = vld [vmem:[#allocation2 + $0x10f] sm:$0xff] }
 0x137   : > { %v1584_v58 = vadd.f32 %v1552_v29, %v1483_v23  ;;  %v1080_v17 = vadd.f32 %v1048_v22, %v979_v43  ;;  %v1149_v4 = vmul.f32 %v2541_v30, %v2675_v34  ;;  %v2937_v39 = vmax.f32 %v546_v37, 0.0 }
 0x138   : > { %v1383_v8 = vadd.f32 %v1351_v54, %v1281_v49  ;;  %v879_v53 = vadd.f32 %v847_v13, %v746_v15  ;;  %v948_v11 = vmul.f32 %v2530_v14, %v2859_v28  ;;  %v1049_v5 = vmul.f32 %v2554_v38, %v2904_v55 }
 0x139   : > { %v1623_v46 = vadd.f32 %v2658_v12, %v1584_v58  ;;  %v1181_v29 = vadd.f32 %v1149_v4, %v1080_v17  ;;  %v1250_v21 = vmul.f32 %v2560_v40, %v2885_v6  ;;  %v1352_v60 = vmul.f32 %v2611_v10, %v2931_v51  ;;  %693 = vst [vmem:[#allocation2 + $0x1f0] sm:$0xff] %v2937_v39  ;;  %v812_v4 = vld [vmem:[#allocation2 + $0xf0] sm:$0xff] }
 0x13a   : > { %v1484_v24 = vadd.f32 %v1452_v19, %v1383_v8  ;;  %v980_v47 = vadd.f32 %v948_v11, %v879_v53  ;;  %v541_v27 = vadd.f32 %v2511_v1, %v540_v41  ;;  %v747_v28 = vmul.f32 %v2516_v3, %v2877_v20  ;;  %v2212_v20 = vpop.f32.mrf.mxu0  ;;  %v2966_v19 = vld [vmem:[#allocation2 + $0x111] sm:$0xff] }
 0x13b   : > { %2260 = vmatprep.mubr.f32.mxu1 %v1623_v46  ;;  %v1282_v22 = vadd.f32 %v1250_v21, %v1181_v29  ;;  %v1453_v0 = vmul.f32 %v2546_v32, %v2697_v44  ;;  %v1554_v25 = vmul.f32 %v2597_v63, %v2939_v42  ;;  %v848_v54 = vmul.f32 %v2522_v7, %v2675_v34  ;;  %v2985_v21 = vld [vmem:[#allocation2 + $0x127] sm:$0xff] }
 0x13c   : > { %v1585_v23 = vadd.f32 %v1553_v56, %v1484_v24  ;;  %v1081_v43 = vadd.f32 %v1049_v5, %v980_v47  ;;  %v1150_v37 = vmul.f32 %v2541_v30, %v2666_v52  ;;  %v2964_v15 = vmax.f32 %v541_v27, 0.0 }
 0x13d   : > { %v1384_v49 = vadd.f32 %v1352_v60, %v1282_v22  ;;  %v880_v13 = vadd.f32 %v848_v54, %v747_v28  ;;  %v949_v58 = vmul.f32 %v2530_v14, %v2885_v6  ;;  %v1050_v17 = vmul.f32 %v2554_v38, %v2931_v51 }
 0x13e   : > { %v1624_v34 = vadd.f32 %v2658_v12, %v1585_v23  ;;  %v1182_v56 = vadd.f32 %v1150_v37, %v1081_v43  ;;  %v1251_v52 = vmul.f32 %v2560_v40, %v2912_v57  ;;  %v1353_v41 = vmul.f32 %v2611_v10, %v2958_v33  ;;  %692 = vst [vmem:[#allocation2 + $0x1e8] sm:$0xff] %v2964_v15  ;;  %v813_v37 = vld [vmem:[#allocation2 + $0x108] sm:$0xff] }
 0x13f   : > { %v1485_v8 = vadd.f32 %v1453_v0, %v1384_v49  ;;  %v981_v53 = vadd.f32 %v949_v58, %v880_v13  ;;  %v556_v11 = vadd.f32 %v2212_v20, %v2511_v1  ;;  %v748_v6 = vmul.f32 %v2516_v3, %v2904_v55  ;;  %v550_v55 = vpop.f32.mrf.mxu0  ;;  %v2992_v0 = vld [vmem:[#allocation2 + $0x129] sm:$0xff] }
 0x140   : > { %2261 = vmatmul.mubr.f32.gmra.mxu1 %v1624_v34  ;;  %v1283_v5 = vadd.f32 %v1251_v52, %v1182_v56  ;;  %v1454_v46 = vmul.f32 %v2546_v32, %v2686_v35  ;;  %v1555_v29 = vmul.f32 %v2597_v63, %v2966_v19  ;;  %v849_v60 = vmul.f32 %v2522_v7, %v812_v4  ;;  %v1318_v52 = vld [vmem:[#allocation2 + $0x12f] sm:$0xff] }
 0x141   : > { %v1586_v24 = vadd.f32 %v1554_v25, %v1485_v8  ;;  %v1082_v47 = vadd.f32 %v1050_v17, %v981_v53  ;;  %v1151_v27 = vmul.f32 %v2541_v30, %v2697_v44  ;;  %v2990_v28 = vmax.f32 %v556_v11, 0.0 }
 0x142   : > { %v1385_v22 = vadd.f32 %v1353_v41, %v1283_v5  ;;  %v881_v54 = vadd.f32 %v849_v60, %v748_v6  ;;  %v950_v23 = vmul.f32 %v2530_v14, %v2912_v57  ;;  %v1051_v43 = vmul.f32 %v2554_v38, %v2958_v33  ;;  %v814_v6 = vld [vmem:[#allocation2 + $0x110] sm:$0xff] }
 0x143   : > { %v1625_v25 = vadd.f32 %v2658_v12, %v1586_v24  ;;  %v1183_v20 = vadd.f32 %v1151_v27, %v1082_v47  ;;  %v1252_v44 = vmul.f32 %v2560_v40, %v2939_v42  ;;  %v1354_v49 = vmul.f32 %v2611_v10, %v2985_v21  ;;  %695 = vst [vmem:[#allocation2 + $0x210] sm:$0xff] %v2990_v28 }
 0x144   : > { %v1486_v13 = vadd.f32 %v1454_v46, %v1385_v22  ;;  %v982_v58 = vadd.f32 %v950_v23, %v881_v54  ;;  %v551_v17 = vadd.f32 %v2511_v1, %v550_v55  ;;  %v749_v57 = vmul.f32 %v2516_v3, %v2931_v51  ;;  %v1520_v55 = vld [vmem:[#allocation2 + $0x131] sm:$0xff]  ;;  %v3025_v54 = vld [vmem:[#allocation2 + $0x147] sm:$0xff] }
 0x145   : > { %2263 = vmatprep.mubr.f32.mxu1 %v1625_v25  ;;  %v1284_v4 = vadd.f32 %v1252_v44, %v1183_v20  ;;  %v1455_v34 = vmul.f32 %v2546_v32, %v2721_v31  ;;  %v1556_v56 = vmul.f32 %v2597_v63, %v2992_v0  ;;  %v850_v41 = vmul.f32 %v2522_v7, %v813_v37 }
 0x146   : > { %v1587_v8 = vadd.f32 %v1555_v29, %v1486_v13  ;;  %v1083_v53 = vadd.f32 %v1051_v43, %v982_v58  ;;  %v1152_v11 = vmul.f32 %v2541_v30, %v2686_v35  ;;  %v3014_v1 = vmax.f32 %v551_v17, 0.0  ;;  %v1521_v13 = vld [vmem:[#allocation2 + $0x149] sm:$0xff] }
 0x147   : > { %v1386_v51 = vadd.f32 %v1354_v49, %v1284_v4  ;;  %v882_v5 = vadd.f32 %v850_v41, %v749_v57  ;;  %v951_v46 = vmul.f32 %v2530_v14, %v2939_v42  ;;  %v1052_v60 = vmul.f32 %v2554_v38, %v2985_v21  ;;  %v1117_v4 = vld [vmem:[#allocation2 + $0x130] sm:$0xff] }
 0x148   : > { %v1626_v24 = vadd.f32 %v2658_v12, %v1587_v8  ;;  %v1184_v47 = vadd.f32 %v1152_v11, %v1083_v53  ;;  %v1253_v29 = vmul.f32 %v2560_v40, %v2966_v19  ;;  %v1355_v27 = vmul.f32 %v2611_v10, %v1318_v52  ;;  %694 = vst [vmem:[#allocation2 + $0x208] sm:$0xff] %v3014_v1 }
 0x149   : > { %v1487_v35 = vadd.f32 %v1455_v34, %v1386_v51  ;;  %v983_v22 = vadd.f32 %v951_v46, %v882_v5  ;;  %v750_v42 = vmul.f32 %v2516_v3, %v2958_v33  ;;  %v851_v23 = vmul.f32 %v2522_v7, %v814_v6  ;;  %v3049_v6 = vld [vmem:[#allocation2 + $0x14f] sm:$0xff] }
 0x14a   : > { %2264 = vmatmul.mubr.f32.gmra.mxu1 %v1626_v24  ;;  %v1285_v43 = vadd.f32 %v1253_v29, %v1184_v47  ;;  %v1456_v37 = vmul.f32 %v2546_v32, %v576_v16  ;;  %v1153_v25 = vmul.f32 %v2541_v30, %v2721_v31  ;;  %v952_v20 = vmul.f32 %v2530_v14, %v2966_v19 }
 0x14b   : > { %v1588_v44 = vadd.f32 %v1556_v56, %v1487_v35  ;;  %v1084_v49 = vadd.f32 %v1052_v60, %v983_v22  ;;  %v883_v58 = vadd.f32 %v851_v23, %v750_v42  ;;  %v1053_v33 = vmul.f32 %v2554_v38, %v1318_v52 }
 0x14c   : > { %v1387_v17 = vadd.f32 %v1355_v27, %v1285_v43  ;;  %v1557_v57 = vmul.f32 %v2597_v63, %v1520_v55  ;;  %v1254_v62 = vmul.f32 %v2560_v40, %v2992_v0  ;;  %v1356_v16 = vmul.f32 %v2611_v10, %v3025_v54  ;;  %v3072_v43 = vld [vmem:[#allocation2 + $0x167] sm:$0xff] }
 0x14d   : > { %v1627_v34 = vadd.f32 %v2658_v12, %v1588_v44  ;;  %v1185_v41 = vadd.f32 %v1153_v25, %v1084_v49  ;;  %v984_v19 = vadd.f32 %v952_v20, %v883_v58  ;;  %v751_v56 = vmul.f32 %v2516_v3, %v2985_v21  ;;  %v3055_v3 = vld [vmem:[#allocation2 + $0x151] sm:$0xff] }
 0x14e   : > { %v1488_v8 = vadd.f32 %v1456_v37, %v1387_v17  ;;  %v1457_v53 = vmul.f32 %v2546_v32, %v2744_v61  ;;  %v1558_v11 = vmul.f32 %v2597_v63, %v1521_v13  ;;  %v852_v51 = vmul.f32 %v2522_v7, %v2721_v31  ;;  %v3066_v31 = vld [vmem:[%s3394_s3] ss:$0 sm:$0xff]  ;;  %v3077_v37 = vld [vmem:[%s3394_s3 + $0x1] ss:$0 sm:$0xff] }
 0x14f   : > { %2266 = vmatprep.mubr.f32.mxu1 %v1627_v34  ;;  %v1286_v5 = vadd.f32 %v1254_v62, %v1185_v41  ;;  %v1085_v46 = vadd.f32 %v1053_v33, %v984_v19  ;;  %v1154_v60 = vmul.f32 %v2541_v30, %v1117_v4  ;;  %v1255_v24 = vmul.f32 %v2560_v40, %v1520_v55  ;;  %v3087_v33 = vld [vmem:[%s3394_s3 + $0x2] ss:$0 sm:$0xff]  ;;  %v1523_v41 = vld [vmem:[#allocation2 + $0x169] sm:$0xff] }
 0x150   : > { %v1589_v47 = vadd.f32 %v1557_v57, %v1488_v8  ;;  %v884_v21 = vadd.f32 %v852_v51, %v751_v56  ;;  %v953_v29 = vmul.f32 %v2530_v14, %v2992_v0  ;;  %v1054_v27 = vmul.f32 %v2554_v38, %v3025_v54  ;;  %v3107_v51 = vld [vmem:[#allocation2 + $0x16f] sm:$0xff] }
 0x151   : > { %v1388_v35 = vadd.f32 %v1356_v16, %v1286_v5  ;;  %v1186_v22 = vadd.f32 %v1154_v60, %v1085_v46  ;;  %v1357_v7 = vmul.f32 %v2611_v10, %v3049_v6  ;;  %v752_v42 = vmul.f32 %v3066_v31, %v1318_v52 }
 0x152   : > { %v1628_v23 = vadd.f32 %v2658_v12, %v1589_v47  ;;  %v1458_v14 = vmul.f32 %v2546_v32, %v2732_v48  ;;  %v985_v0 = vadd.f32 %v953_v29, %v884_v21  ;;  %v853_v25 = vmul.f32 %v3077_v37, %v1117_v4  ;;  %v3115_v21 = vld [vmem:[%s3394_s3 + $0x7] ss:$0 sm:$0xff] }
 0x153   : > { %v1489_v20 = vadd.f32 %v1457_v53, %v1388_v35  ;;  %v1287_v44 = vadd.f32 %v1255_v24, %v1186_v22  ;;  %v1559_v52 = vmul.f32 %v2597_v63, %v3055_v3  ;;  %v1155_v49 = vmul.f32 %v2541_v30, %v2744_v61  ;;  %v818_v24 = vld [vmem:[#allocation2 + $0x150] sm:$0xff] }
 0x154   : > { %2267 = vmatmul.mubr.f32.gmra.mxu1 %v1628_v23  ;;  %v1086_v32 = vadd.f32 %v1054_v27, %v985_v0  ;;  %v885_v58 = vadd.f32 %v853_v25, %v752_v42  ;;  %v954_v17 = vmul.f32 %v3087_v33, %v1520_v55  ;;  %v1055_v57 = vmul.f32 %v2554_v38, %v3049_v6 }
 0x155   : > { %v1590_v62 = vadd.f32 %v1558_v11, %v1489_v20  ;;  %v1389_v16 = vadd.f32 %v1357_v7, %v1287_v44  ;;  %v1256_v4 = vmul.f32 %v2560_v40, %v1521_v13  ;;  %v1358_v30 = vmul.f32 %v2611_v10, %v3072_v43  ;;  %v3103_v11 = vld [vmem:[%s3394_s3 + $0x4] ss:$0 sm:$0xff]  ;;  %v1524_v7 = vld [vmem:[#allocation2 + $0x171] sm:$0xff] }
 0x156   : > { %v1187_v34 = vadd.f32 %v1155_v49, %v1086_v32  ;;  %v986_v19 = vadd.f32 %v954_v17, %v885_v58  ;;  %v753_v56 = vmul.f32 %v3066_v31, %v3025_v54  ;;  %v854_v8 = vmul.f32 %v3077_v37, %v2744_v61  ;;  %v1323_v32 = vld [vmem:[#allocation2 + $0x187] sm:$0xff] }
 0x157   : > { %v1629_v55 = vadd.f32 %v2658_v12, %v1590_v62  ;;  %v1490_v53 = vadd.f32 %v1458_v14, %v1389_v16  ;;  %v1156_v40 = vmul.f32 %v3103_v11, %v2732_v48  ;;  %v955_v5 = vmul.f32 %v3087_v33, %v1521_v13  ;;  %v3123_v13 = vld [vmem:[%s3394_s3 + $0x5] ss:$0 sm:$0xff] }
 0x158   : > { %v1288_v46 = vadd.f32 %v1256_v4, %v1187_v34  ;;  %v1087_v54 = vadd.f32 %v1055_v57, %v986_v19  ;;  %v886_v60 = vadd.f32 %v854_v8, %v753_v56  ;;  %v1056_v61 = vmul.f32 %v2554_v38, %v3072_v43 }
 0x159   : > { %2269 = vmatprep.mubr.f32.mxu1 %v1629_v55  ;;  %v1591_v47 = vadd.f32 %v1559_v52, %v1490_v53  ;;  %v1459_v48 = vmul.f32 %v3115_v21, %v2768_v2  ;;  %v1560_v29 = vmul.f32 %v2597_v63, %v1523_v41  ;;  %v1257_v38 = vmul.f32 %v3123_v13, %v3055_v3 }
 0x15a   : > { %v1390_v27 = vadd.f32 %v1358_v30, %v1288_v46  ;;  %v1188_v35 = vadd.f32 %v1156_v40, %v1087_v54  ;;  %v1359_v22 = vmul.f32 %v2611_v10, %v3107_v51  ;;  %v987_v42 = vadd.f32 %v955_v5, %v886_v60  ;;  %v1324_v46 = vld [vmem:[#allocation2 + $0x18f] sm:$0xff] }
 0x15b   : > { %v1630_v23 = vadd.f32 %v2658_v12, %v1591_v47  ;;  %v1460_v14 = vmul.f32 %v3115_v21, %v2756_v18  ;;  %v754_v0 = vmul.f32 %v3066_v31, %v3049_v6  ;;  %v855_v25 = vmul.f32 %v3077_v37, %v818_v24  ;;  %v3143_v6 = vld [vmem:[%s3394_s3 + $0x3] ss:$0 sm:$0xff]  ;;  %v820_v24 = vld [vmem:[#allocation2 + $0x170] sm:$0xff] }
 0x15c   : > { %v1491_v20 = vadd.f32 %v1459_v48, %v1390_v27  ;;  %v1289_v44 = vadd.f32 %v1257_v38, %v1188_v35  ;;  %v1088_v52 = vadd.f32 %v1056_v61, %v987_v42  ;;  %v1157_v49 = vmul.f32 %v3103_v11, %v2768_v2  ;;  %v3163_v48 = vld [vmem:[%s3394_s3 + $0x8] ss:$0 sm:$0xff] }
 0x15d   : > { %2270 = vmatmul.mubr.f32.gmra.mxu1 %v1630_v23  ;;  %v1561_v58 = vmul.f32 %v2597_v63, %v1524_v7  ;;  %v887_v17 = vadd.f32 %v855_v25, %v754_v0  ;;  %v956_v57 = vmul.f32 %v3087_v33, %v3055_v3  ;;  %v1057_v62 = vmul.f32 %v3143_v6, %v3107_v51  ;;  %v1525_v63 = vld [vmem:[#allocation2 + $0x189] sm:$0xff]  ;;  %v1526_v23 = vld [vmem:[#allocation2 + $0x191] sm:$0xff] }
 0x15e   : > { %v1592_v16 = vadd.f32 %v1560_v29, %v1491_v20  ;;  %v1391_v4 = vadd.f32 %v1359_v22, %v1289_v44  ;;  %v1189_v30 = vadd.f32 %v1157_v49, %v1088_v52  ;;  %v1258_v34 = vmul.f32 %v3123_v13, %v1523_v41  ;;  %v1325_v49 = vld [vmem:[#allocation2 + $0x1a7] sm:$0xff] }
 0x15f   : > { %v1360_v19 = vmul.f32 %v2611_v10, %v1323_v32  ;;  %v988_v56 = vadd.f32 %v956_v57, %v887_v17  ;;  %v755_v3 = vmul.f32 %v3066_v31, %v3072_v43  ;;  %v856_v8 = vmul.f32 %v3077_v37, %v2768_v2 }
 0x160   : > { %v1631_v55 = vadd.f32 %v2658_v12, %v1592_v16  ;;  %v1492_v53 = vadd.f32 %v1460_v14, %v1391_v4  ;;  %v1290_v40 = vadd.f32 %v1258_v34, %v1189_v30  ;;  %v1158_v5 = vmul.f32 %v3103_v11, %v2756_v18  ;;  %v3185_v34 = vld [vmem:[#allocation2 + $0x1a9] sm:$0xff] }
 0x161   : > { %v1089_v54 = vadd.f32 %v1057_v62, %v988_v56  ;;  %v888_v60 = vadd.f32 %v856_v8, %v755_v3  ;;  %v957_v10 = vmul.f32 %v3087_v33, %v1523_v41  ;;  %v1058_v61 = vmul.f32 %v3143_v6, %v1323_v32  ;;  %v3170_v41 = vld [vmem:[%s3394_s3 + $0x6] ss:$0 sm:$0xff] }
 0x162   : > { %2272 = vmatprep.mubr.f32.mxu1 %v1631_v55  ;;  %v1593_v43 = vadd.f32 %v1561_v58, %v1492_v53  ;;  %v1392_v47 = vadd.f32 %v1360_v19, %v1290_v40  ;;  %v1461_v2 = vmul.f32 %v3115_v21, %v2803_v26  ;;  %v1562_v18 = vmul.f32 %v3163_v48, %v1525_v63  ;;  %v1326_v40 = vld [vmem:[#allocation2 + $0x1af] sm:$0xff] }
 0x163   : > { %v1190_v29 = vadd.f32 %v1158_v5, %v1089_v54  ;;  %v1259_v38 = vmul.f32 %v3123_v13, %v1524_v7  ;;  %v1361_v27 = vmul.f32 %v3170_v41, %v1324_v46  ;;  %v989_v35 = vadd.f32 %v957_v10, %v888_v60 }
 0x164   : > { %v1632_v22 = vadd.f32 %v2658_v12, %v1593_v43  ;;  %v1493_v42 = vadd.f32 %v1461_v2, %v1392_v47  ;;  %v756_v14 = vmul.f32 %v3066_v31, %v3107_v51  ;;  %v857_v0 = vmul.f32 %v3077_v37, %v820_v24 }
 0x165   : > { %v1291_v25 = vadd.f32 %v1259_v38, %v1190_v29  ;;  %v1462_v20 = vmul.f32 %v3115_v21, %v2779_v50  ;;  %v1090_v44 = vadd.f32 %v1058_v61, %v989_v35  ;;  %v1159_v52 = vmul.f32 %v3103_v11, %v2803_v26  ;;  %v3206_v38 = vld [vmem:[%s3395_s4] ss:$0 sm:$0xff] }
 0x166   : > { %2273 = vmatmul.mubr.f32.gmra.mxu1 %v1632_v22  ;;  %v1594_v58 = vadd.f32 %v1562_v18, %v1493_v42  ;;  %v889_v17 = vadd.f32 %v857_v0, %v756_v14  ;;  %v958_v57 = vmul.f32 %v3087_v33, %v1524_v7  ;;  %v1059_v62 = vmul.f32 %v3143_v6, %v1324_v46  ;;  %v1327_v22 = vld [vmem:[#allocation2 + $0x1c7] sm:$0xff] }
 0x167   : > { %v1393_v16 = vadd.f32 %v1361_v27, %v1291_v25  ;;  %v1563_v51 = vmul.f32 %v3163_v48, %v1526_v23  ;;  %v1191_v4 = vadd.f32 %v1159_v52, %v1090_v44  ;;  %v1260_v30 = vmul.f32 %v3123_v13, %v1525_v63  ;;  %v1528_v27 = vld [vmem:[#allocation2 + $0x1b1] sm:$0xff]  ;;  %v1529_v52 = vld [vmem:[#allocation2 + $0x1c9] sm:$0xff] }
 0x168   : > { %v1633_v19 = vadd.f32 %v2658_v12, %v1594_v58  ;;  %v1362_v56 = vmul.f32 %v3170_v41, %v1325_v49  ;;  %v990_v3 = vadd.f32 %v958_v57, %v889_v17  ;;  %v757_v8 = vmul.f32 %v3066_v31, %v1323_v32  ;;  %v822_v32 = vld [vmem:[#allocation2 + $0x190] sm:$0xff] }
 0x169   : > { %v1494_v55 = vadd.f32 %v1462_v20, %v1393_v16  ;;  %v1292_v53 = vadd.f32 %v1260_v30, %v1191_v4  ;;  %v1463_v7 = vmul.f32 %v3115_v21, %v2857_v59  ;;  %v858_v5 = vmul.f32 %v3077_v37, %v2803_v26 }
 0x16a   : > { %2275 = vmatprep.mubr.f32.mxu1 %v1633_v19  ;;  %v1564_v54 = vmul.f32 %v3163_v48, %v3185_v34  ;;  %v1091_v60 = vadd.f32 %v1059_v62, %v990_v3  ;;  %v1160_v12 = vmul.f32 %v3103_v11, %v2779_v50  ;;  %v959_v10 = vmul.f32 %v3087_v33, %v1525_v63 }
 0x16b   : > { %v1595_v61 = vadd.f32 %v1563_v51, %v1494_v55  ;;  %v1394_v24 = vadd.f32 %v1362_v56, %v1292_v53  ;;  %v890_v43 = vadd.f32 %v858_v5, %v757_v8  ;;  %v1060_v47 = vmul.f32 %v3143_v6, %v1325_v49  ;;  %v1328_v55 = vld [vmem:[#allocation2 + $0x1cf] sm:$0xff] }
 0x16c   : > { %v1192_v2 = vadd.f32 %v1160_v12, %v1091_v60  ;;  %v1261_v18 = vmul.f32 %v3123_v13, %v1526_v23  ;;  %v1363_v26 = vmul.f32 %v3170_v41, %v1326_v40  ;;  %v758_v29 = vmul.f32 %v3066_v31, %v1324_v46  ;;  %v824_v12 = vld [vmem:[#allocation2 + $0x1b0] sm:$0xff] }
 0x16d   : > { %v1634_v50 = vadd.f32 %v3206_v38, %v1595_v61  ;;  %v1495_v63 = vadd.f32 %v1463_v7, %v1394_v24  ;;  %v991_v35 = vadd.f32 %v959_v10, %v890_v43  ;;  %v859_v42 = vmul.f32 %v3077_v37, %v822_v32  ;;  %v3230_v10 = vld [vmem:[#allocation2 + $0x1d1] sm:$0xff] }
 0x16e   : > { %v1293_v14 = vadd.f32 %v1261_v18, %v1192_v2  ;;  %v1464_v0 = vmul.f32 %v3115_v21, %v2831_v9  ;;  %v1161_v46 = vmul.f32 %v3103_v11, %v2857_v59  ;;  %v960_v25 = vmul.f32 %v3087_v33, %v1526_v23 }
 0x16f   : > { %2276 = vmatmul.mubr.f32.gmra.mxu1 %v1634_v50  ;;  %v1596_v20 = vadd.f32 %v1564_v54, %v1495_v63  ;;  %v1092_v44 = vadd.f32 %v1060_v47, %v991_v35  ;;  %v891_v58 = vadd.f32 %v859_v42, %v758_v29  ;;  %v1061_v17 = vmul.f32 %v3143_v6, %v1326_v40  ;;  %v1329_v29 = vld [vmem:[#allocation2 + $0x1e7] sm:$0xff] }
 0x170   : > { %v1395_v57 = vadd.f32 %v1363_v26, %v1293_v14  ;;  %v1565_v62 = vmul.f32 %v3163_v48, %v1528_v27  ;;  %v1262_v16 = vmul.f32 %v3123_v13, %v3185_v34  ;;  %v1364_v51 = vmul.f32 %v3170_v41, %v1327_v22 }
 0x171   : > { %v1635_v4 = vadd.f32 %v3206_v38, %v1596_v20  ;;  %v1193_v30 = vadd.f32 %v1161_v46, %v1092_v44  ;;  %v992_v19 = vadd.f32 %v960_v25, %v891_v58  ;;  %v759_v23 = vmul.f32 %v3066_v31, %v1325_v49 }
 0x172   : > { %v1496_v56 = vadd.f32 %v1464_v0, %v1395_v57  ;;  %v1465_v3 = vmul.f32 %v3115_v21, %v2910_v45  ;;  %v1566_v8 = vmul.f32 %v3163_v48, %v1529_v52  ;;  %v860_v53 = vmul.f32 %v3077_v37, %v2857_v59  ;;  %v1531_v57 = vld [vmem:[#allocation2 + $0x1e9] sm:$0xff] }
 0x173   : > { %2278 = vmatprep.mubr.f32.mxu1 %v1635_v4  ;;  %v1294_v7 = vadd.f32 %v1262_v16, %v1193_v30  ;;  %v1093_v5 = vadd.f32 %v1061_v17, %v992_v19  ;;  %v1162_v54 = vmul.f32 %v3103_v11, %v2831_v9  ;;  %v1263_v60 = vmul.f32 %v3123_v13, %v1528_v27  ;;  %v1330_v19 = vld [vmem:[#allocation2 + $0x1ef] sm:$0xff] }
 0x174   : > { %v1597_v49 = vadd.f32 %v1565_v62, %v1496_v56  ;;  %v892_v32 = vadd.f32 %v860_v53, %v759_v23  ;;  %v961_v61 = vmul.f32 %v3087_v33, %v3185_v34  ;;  %v1062_v24 = vmul.f32 %v3143_v6, %v1327_v22 }
 0x175   : > { %v1396_v43 = vadd.f32 %v1364_v51, %v1294_v7  ;;  %v1194_v59 = vadd.f32 %v1162_v54, %v1093_v5  ;;  %v1365_v47 = vmul.f32 %v3170_v41, %v1328_v55  ;;  %v760_v2 = vmul.f32 %v3066_v31, %v1326_v40  ;;  %v826_v7 = vld [vmem:[#allocation2 + $0x1d0] sm:$0xff] }
 0x176   : > { %v1636_v9 = vadd.f32 %v3206_v38, %v1597_v49  ;;  %v1466_v18 = vmul.f32 %v3115_v21, %v2883_v36  ;;  %v993_v26 = vadd.f32 %v961_v61, %v892_v32  ;;  %v861_v50 = vmul.f32 %v3077_v37, %v824_v12  ;;  %v1532_v12 = vld [vmem:[#allocation2 + $0x1f1] sm:$0xff] }
 0x177   : > { %v1497_v63 = vadd.f32 %v1465_v3, %v1396_v43  ;;  %v1295_v35 = vadd.f32 %v1263_v60, %v1194_v59  ;;  %v1567_v34 = vmul.f32 %v3163_v48, %v3230_v10  ;;  %v1163_v42 = vmul.f32 %v3103_v11, %v2910_v45 }
 0x178   : > { %2279 = vmatmul.mubr.f32.gmra.mxu1 %v1636_v9  ;;  %v1094_v14 = vadd.f32 %v1062_v24, %v993_v26  ;;  %v893_v40 = vadd.f32 %v861_v50, %v760_v2  ;;  %v962_v0 = vmul.f32 %v3087_v33, %v1528_v27  ;;  %v1063_v46 = vmul.f32 %v3143_v6, %v1328_v55 }
 0x179   : > { %v1598_v25 = vadd.f32 %v1566_v8, %v1497_v63  ;;  %v1397_v20 = vadd.f32 %v1365_v47, %v1295_v35  ;;  %v1264_v44 = vmul.f32 %v3123_v13, %v1529_v52  ;;  %v1366_v58 = vmul.f32 %v3170_v41, %v1329_v29 }
 0x17a   : > { %v1195_v17 = vadd.f32 %v1163_v42, %v1094_v14  ;;  %v994_v62 = vadd.f32 %v962_v0, %v893_v40  ;;  %v761_v16 = vmul.f32 %v3066_v31, %v1327_v22  ;;  %v862_v51 = vmul.f32 %v3077_v37, %v2910_v45  ;;  %v1533_v0 = vld [vmem:[#allocation2 + $0x209] sm:$0xff] }
 0x17b   : > { %v1637_v4 = vadd.f32 %v3206_v38, %v1598_v25  ;;  %v1498_v30 = vadd.f32 %v1466_v18, %v1397_v20  ;;  %v1164_v27 = vmul.f32 %v3103_v11, %v2883_v36  ;;  %v963_v23 = vmul.f32 %v3087_v33, %v1529_v52  ;;  %v1331_v18 = vld [vmem:[#allocation2 + $0x207] sm:$0xff] }
 0x17c   : > { %v1296_v56 = vadd.f32 %v1264_v44, %v1195_v17  ;;  %v1095_v3 = vadd.f32 %v1063_v46, %v994_v62  ;;  %v894_v8 = vadd.f32 %v862_v51, %v761_v16  ;;  %v1064_v53 = vmul.f32 %v3143_v6, %v1329_v29  ;;  %v1332_v62 = vld [vmem:[#allocation2 + $0x20f] sm:$0xff] }
 0x17d   : > { %2281 = vmatprep.mubr.f32.mxu1 %v1637_v4  ;;  %v1599_v22 = vadd.f32 %v1567_v34, %v1498_v30  ;;  %v1467_v45 = vmul.f32 %v3115_v21, %v2964_v15  ;;  %v1568_v5 = vmul.f32 %v3163_v48, %v1531_v57  ;;  %v1265_v54 = vmul.f32 %v3123_v13, %v3230_v10 }
 0x17e   : > { %v1398_v36 = vadd.f32 %v1366_v58, %v1296_v56  ;;  %v1196_v60 = vadd.f32 %v1164_v27, %v1095_v3  ;;  %v1367_v52 = vmul.f32 %v3170_v41, %v1330_v19  ;;  %v995_v49 = vadd.f32 %v963_v23, %v894_v8  ;;  %v828_v27 = vld [vmem:[#allocation2 + $0x1f0] sm:$0xff] }
 0x17f   : > { %v1638_v32 = vadd.f32 %v3206_v38, %v1599_v22  ;;  %v1468_v61 = vmul.f32 %v3115_v21, %v2937_v39  ;;  %v762_v24 = vmul.f32 %v3066_v31, %v1328_v55  ;;  %v863_v43 = vmul.f32 %v3077_v37, %v826_v7  ;;  %v1333_v22 = vld [vmem:[#allocation2 + $0x227] sm:$0xff] }
 0x180   : > { %v1499_v59 = vadd.f32 %v1467_v45, %v1398_v36  ;;  %v1297_v47 = vadd.f32 %v1265_v54, %v1196_v60  ;;  %v1096_v2 = vadd.f32 %v1064_v53, %v995_v49  ;;  %v1165_v9 = vmul.f32 %v3103_v11, %v2964_v15 }
 0x181   : > { %2282 = vmatmul.mubr.f32.gmra.mxu1 %v1638_v32  ;;  %v1569_v26 = vmul.f32 %v3163_v48, %v1532_v12  ;;  %v895_v50 = vadd.f32 %v863_v43, %v762_v24  ;;  %v964_v63 = vmul.f32 %v3087_v33, %v3230_v10  ;;  %v1065_v35 = vmul.f32 %v3143_v6, %v1330_v19  ;;  %v1534_v32 = vld [vmem:[#allocation2 + $0x211] sm:$0xff] }
 0x182   : > { %v1600_v34 = vadd.f32 %v1568_v5, %v1499_v59  ;;  %v1399_v55 = vadd.f32 %v1367_v52, %v1297_v47  ;;  %v1197_v42 = vadd.f32 %v1165_v9, %v1096_v2  ;;  %v1266_v14 = vmul.f32 %v3123_v13, %v1531_v57  ;;  %v1535_v2 = vld [vmem:[#allocation2 + $0x229] sm:$0xff] }
 0x183   : > { %v1368_v40 = vmul.f32 %v3170_v41, %v1331_v18  ;;  %v996_v46 = vadd.f32 %v964_v63, %v895_v50  ;;  %v763_v25 = vmul.f32 %v3066_v31, %v1329_v29  ;;  %v864_v20 = vmul.f32 %v3077_v37, %v2964_v15  ;;  %v2312_v50 = vld [vmem:[#allocation2] sm:$0xff] }
 0x184   : > { %v1639_v44 = vadd.f32 %v3206_v38, %v1600_v34  ;;  %v1500_v58 = vadd.f32 %v1468_v61, %v1399_v55  ;;  %v1298_v10 = vadd.f32 %v1266_v14, %v1197_v42  ;;  %v1166_v17 = vmul.f32 %v3103_v11, %v2937_v39 }
 0x185   : > { %v1097_v16 = vadd.f32 %v1065_v35, %v996_v46  ;;  %v896_v51 = vadd.f32 %v864_v20, %v763_v25  ;;  %v965_v4 = vmul.f32 %v3087_v33, %v1531_v57  ;;  %v1066_v30 = vmul.f32 %v3143_v6, %v1331_v18 }
 0x186   : > { %2284 = vmatprep.mubr.f32.mxu1 %v1639_v44  ;;  %v1601_v29 = vadd.f32 %v1569_v26, %v1500_v58  ;;  %v1400_v23 = vadd.f32 %v1368_v40, %v1298_v10  ;;  %v1469_v15 = vmul.f32 %v3115_v21, %v3014_v1  ;;  %v1570_v56 = vmul.f32 %v3163_v48, %v1533_v0 }
 0x187   : > { %v1198_v3 = vadd.f32 %v1166_v17, %v1097_v16  ;;  %v1267_v8 = vmul.f32 %v3123_v13, %v1532_v12  ;;  %v1369_v39 = vmul.f32 %v3170_v41, %v1332_v62  ;;  %v997_v53 = vadd.f32 %v965_v4, %v896_v51 }
 0x188   : > { %v1640_v7 = vadd.f32 %v3206_v38, %v1601_v29  ;;  %v1501_v57 = vadd.f32 %v1469_v15, %v1400_v23  ;;  %v764_v45 = vmul.f32 %v3066_v31, %v1330_v19  ;;  %v865_v5 = vmul.f32 %v3077_v37, %v828_v27 }
 0x189   : > { %v1299_v54 = vadd.f32 %v1267_v8, %v1198_v3  ;;  %v1470_v36 = vmul.f32 %v3115_v21, %v2990_v28  ;;  %v1098_v60 = vadd.f32 %v1066_v30, %v997_v53  ;;  %v1167_v52 = vmul.f32 %v3103_v11, %v3014_v1 }
 0x18a   : > { %2285 = vmatmul.mubr.f32.gmra.mxu1 %v1640_v7  ;;  %v1602_v49 = vadd.f32 %v1570_v56, %v1501_v57  ;;  %v897_v61 = vadd.f32 %v865_v5, %v764_v45  ;;  %v966_v24 = vmul.f32 %v3087_v33, %v1532_v12  ;;  %v1067_v43 = vmul.f32 %v3143_v6, %v1332_v62  ;;  %v1334_v33 = vld [vmem:[#allocation2 + $0x22f] sm:$0xff] }
 0x18b   : > { %v1401_v59 = vadd.f32 %v1369_v39, %v1299_v54  ;;  %v1199_v31 = vadd.f32 %v1167_v52, %v1098_v60  ;;  %v1268_v37 = vmul.f32 %v3123_v13, %v1533_v0  ;;  %v1370_v19 = vmul.f32 %v3170_v41, %v1333_v22 }
 0x18c   : > { %v1641_v47 = vadd.f32 %v3206_v38, %v1602_v49  ;;  %v998_v9 = vadd.f32 %v966_v24, %v897_v61  ;;  %v1571_v1 = vmul.f32 %v3163_v48, %v1534_v32  ;;  %v1471_v63 = vmul.f32 %v2312_v50, %v3115_v21  ;;  %v1536_v21 = vld [vmem:[#allocation2 + $0x231] sm:$0xff] }
 0x18d   : > { %v1502_v18 = vadd.f32 %v1470_v36, %v1401_v59  ;;  %v1300_v26 = vadd.f32 %v1268_v37, %v1199_v31  ;;  %v1168_v12 = vmul.f32 %v3103_v11, %v2990_v28  ;;  %v1572_v55 = vmul.f32 %v3163_v48, %v1535_v2 }
 0x18e   : > { %2287 = vmatprep.mubr.f32.mxu1 %v1641_v47  ;;  %v1099_v6 = vadd.f32 %v1067_v43, %v998_v9  ;;  %v1269_v14 = vmul.f32 %v3123_v13, %v1534_v32  ;;  %v1371_v40 = vmul.f32 %v3170_v41, %v1334_v33  ;;  %v1573_v28 = vmul.f32 %v3163_v48, %v1536_v21  ;;  %v3315_v41 = vld [vmem:[%s3397_s6] ss:$0 sm:$0xff] }
 0x18f   : > { %v1603_v35 = vadd.f32 %v1571_v1, %v1502_v18  ;;  %v1402_v34 = vadd.f32 %v1370_v19, %v1300_v26 }
 0x190   : > { %v1200_v42 = vadd.f32 %v1168_v12, %v1099_v6 }
 0x191   : > { %v1642_v0 = vadd.f32 %v3206_v38, %v1603_v35  ;;  %v1503_v46 = vadd.f32 %v1471_v63, %v1402_v34 }
 0x192   : > { %v1301_v25 = vadd.f32 %v1269_v14, %v1200_v42 }
 0x193   : > { %2288 = vmatmul.mubr.f32.gmra.mxu1 %v1642_v0  ;;  %v1604_v20 = vadd.f32 %v1572_v55, %v1503_v46 }
 0x194   : > { %v1403_v44 = vadd.f32 %v1371_v40, %v1301_v25 }
 0x195   : > { %v1643_v11 = vadd.f32 %v3206_v38, %v1604_v20 }
 0x196   : > { %v1504_v58 = vadd.f32 %v1471_v63, %v1403_v44 }
 0x197   : > { %2290 = vmatprep.mubr.f32.mxu1 %v1643_v11 }
 0x198   : > { %v1605_v10 = vadd.f32 %v1573_v28, %v1504_v58 }
 0x19a   : > { %v1644_v13 = vadd.f32 %v3206_v38, %v1605_v10 }
 0x19c   : > { %2291 = vmatmul.mubr.f32.gmra.mxu1 %v1644_v13 }
 0x1cc   : > { %v2247_v17 = vpop.f32.mrf.mxu1 }
 0x1cd   : > { %v1740_v62 = vadd.f32 %v2247_v17, %v3315_v41 }
 0x1ce   : > { %v1734_v48 = vpop.f32.mrf.mxu1 }
 0x1cf   : > { %v1894_v38 = vmax.f32 %v1740_v62, 0.0  ;;  %v1735_v16 = vadd.f32 %v3315_v41, %v1734_v48 }
 0x1d1   : > { %1926 = vst [vmem:[%s3323_s18 + $0x8] sm:$0xff] %v1894_v38  ;;  %v1893_v51 = vmax.f32 %v1735_v16, 0.0 }
 0x1d3   : > { %1925 = vst [vmem:[%s3323_s18] sm:$0xff] %v1893_v51 }
 0x1d4   : > { %v2250_v4 = vpop.f32.mrf.mxu1 }
 0x1d5   : > { %v1750_v30 = vadd.f32 %v2250_v4, %v3315_v41 }
 0x1d6   : > { %v1744_v27 = vpop.f32.mrf.mxu1 }
 0x1d7   : > { %v1896_v29 = vmax.f32 %v1750_v30, 0.0  ;;  %v1745_v23 = vadd.f32 %v3315_v41, %v1744_v27 }
 0x1d9   : > { %1928 = vst [vmem:[%s3323_s18 + $0x18] sm:$0xff] %v1896_v29  ;;  %v1895_v15 = vmax.f32 %v1745_v23, 0.0 }
 0x1db   : > { %1927 = vst [vmem:[%s3323_s18 + $0x10] sm:$0xff] %v1895_v15 }
 0x1e1   : > { %v2253_v56 = vpop.f32.mrf.mxu1 }
 0x1e2   : > { %v1760_v3 = vadd.f32 %v2253_v56, %v3315_v41 }
 0x1e3   : > { %v1754_v8 = vpop.f32.mrf.mxu1 }
 0x1e4   : > { %v1898_v39 = vmax.f32 %v1760_v3, 0.0  ;;  %v1755_v53 = vadd.f32 %v3315_v41, %v1754_v8 }
 0x1e6   : > { %1930 = vst [vmem:[%s3323_s18 + $0x28] sm:$0xff] %v1898_v39  ;;  %v1897_v7 = vmax.f32 %v1755_v53, 0.0 }
 0x1e8   : > { %1929 = vst [vmem:[%s3323_s18 + $0x20] sm:$0xff] %v1897_v7 }
 0x1ec   : > { %v2256_v57 = vpop.f32.mrf.mxu1 }
 0x1ed   : > { %v1770_v22 = vadd.f32 %v2256_v57, %v3315_v41 }
 0x1ee   : > { %v1764_v45 = vpop.f32.mrf.mxu1 }
 0x1ef   : > { %v1900_v5 = vmax.f32 %v1770_v22, 0.0  ;;  %v1765_v54 = vadd.f32 %v3315_v41, %v1764_v45 }
 0x1f1   : > { %1932 = vst [vmem:[%s3323_s18 + $0x38] sm:$0xff] %v1900_v5  ;;  %v1899_v36 = vmax.f32 %v1765_v54, 0.0 }
 0x1f3   : > { %1931 = vst [vmem:[%s3323_s18 + $0x30] sm:$0xff] %v1899_v36 }
 0x1f6   : > { %v2259_v60 = vpop.f32.mrf.mxu1 }
 0x1f7   : > { %v1780_v52 = vadd.f32 %v2259_v60, %v3315_v41 }
 0x1f8   : > { %v1774_v49 = vpop.f32.mrf.mxu1 }
 0x1f9   : > { %v1902_v32 = vmax.f32 %v1780_v52, 0.0  ;;  %v1775_v61 = vadd.f32 %v3315_v41, %v1774_v49 }
 0x1fb   : > { %1934 = vst [vmem:[%s3323_s18 + $0x48] sm:$0xff] %v1902_v32  ;;  %v1901_v24 = vmax.f32 %v1775_v61, 0.0 }
 0x1fd   : > { %1933 = vst [vmem:[%s3323_s18 + $0x40] sm:$0xff] %v1901_v24 }
 0x200   : > { %v2262_v43 = vpop.f32.mrf.mxu1 }
 0x201   : > { %v1790_v59 = vadd.f32 %v2262_v43, %v3315_v41 }
 0x202   : > { %v1784_v31 = vpop.f32.mrf.mxu1 }
 0x203   : > { %v1904_v37 = vmax.f32 %v1790_v59, 0.0  ;;  %v1785_v19 = vadd.f32 %v3315_v41, %v1784_v31 }
 0x205   : > { %1936 = vst [vmem:[%s3323_s18 + $0x58] sm:$0xff] %v1904_v37  ;;  %v1903_v47 = vmax.f32 %v1785_v19, 0.0 }
 0x207   : > { %1935 = vst [vmem:[%s3323_s18 + $0x50] sm:$0xff] %v1903_v47 }
 0x20a   : > { %v2265_v2 = vpop.f32.mrf.mxu1 }
 0x20b   : > { %v1800_v9 = vadd.f32 %v2265_v2, %v3315_v41 }
 0x20c   : > { %v1794_v18 = vpop.f32.mrf.mxu1 }
 0x20d   : > { %v1906_v1 = vmax.f32 %v1800_v9, 0.0  ;;  %v1795_v26 = vadd.f32 %v3315_v41, %v1794_v18 }
 0x20f   : > { %1938 = vst [vmem:[%s3323_s18 + $0x68] sm:$0xff] %v1906_v1  ;;  %v1905_v50 = vmax.f32 %v1795_v26, 0.0 }
 0x211   : > { %1937 = vst [vmem:[%s3323_s18 + $0x60] sm:$0xff] %v1905_v50 }
 0x214   : > { %v2268_v63 = vpop.f32.mrf.mxu1 }
 0x215   : > { %v1810_v33 = vadd.f32 %v2268_v63, %v3315_v41 }
 0x216   : > { %v1804_v6 = vpop.f32.mrf.mxu1 }
 0x217   : > { %v1908_v12 = vmax.f32 %v1810_v33, 0.0  ;;  %v1805_v35 = vadd.f32 %v3315_v41, %v1804_v6 }
 0x219   : > { %1940 = vst [vmem:[%s3323_s18 + $0x78] sm:$0xff] %v1908_v12  ;;  %v1907_v34 = vmax.f32 %v1805_v35, 0.0 }
 0x21b   : > { %1939 = vst [vmem:[%s3323_s18 + $0x70] sm:$0xff] %v1907_v34 }
 0x21d   : > { %v2271_v55 = vpop.f32.mrf.mxu1 }
 0x21e   : > { %v1820_v42 = vadd.f32 %v2271_v55, %v3315_v41 }
 0x21f   : > { %v1814_v14 = vpop.f32.mrf.mxu1 }
 0x220   : > { %v1910_v40 = vmax.f32 %v1820_v42, 0.0  ;;  %v1815_v0 = vadd.f32 %v3315_v41, %v1814_v14 }
 0x222   : > { %1942 = vst [vmem:[%s3323_s18 + $0x88] sm:$0xff] %v1910_v40  ;;  %v1909_v46 = vmax.f32 %v1815_v0, 0.0 }
 0x224   : > { %1941 = vst [vmem:[%s3323_s18 + $0x80] sm:$0xff] %v1909_v46 }
 0x226   : > { %v2274_v21 = vpop.f32.mrf.mxu1 }
 0x227   : > { %v1830_v25 = vadd.f32 %v2274_v21, %v3315_v41 }
 0x228   : > { %v1824_v20 = vpop.f32.mrf.mxu1 }
 0x229   : > { %v1912_v44 = vmax.f32 %v1830_v25, 0.0  ;;  %v1825_v28 = vadd.f32 %v3315_v41, %v1824_v20 }
 0x22b   : > { %1944 = vst [vmem:[%s3323_s18 + $0x98] sm:$0xff] %v1912_v44  ;;  %v1911_v11 = vmax.f32 %v1825_v28, 0.0 }
 0x22d   : > { %1943 = vst [vmem:[%s3323_s18 + $0x90] sm:$0xff] %v1911_v11 }
 0x22f   : > { %v2277_v58 = vpop.f32.mrf.mxu1 }
 0x230   : > { %v1840_v10 = vadd.f32 %v2277_v58, %v3315_v41 }
 0x231   : > { %v1834_v13 = vpop.f32.mrf.mxu1 }
 0x232   : > { %v1914_v17 = vmax.f32 %v1840_v10, 0.0  ;;  %v1835_v62 = vadd.f32 %v3315_v41, %v1834_v13 }
 0x234   : > { %1946 = vst [vmem:[%s3323_s18 + $0xa8] sm:$0xff] %v1914_v17  ;;  %v1913_v48 = vmax.f32 %v1835_v62, 0.0 }
 0x236   : > { %1945 = vst [vmem:[%s3323_s18 + $0xa0] sm:$0xff] %v1913_v48 }
 0x238   : > { %v2280_v38 = vpop.f32.mrf.mxu1 }
 0x239   : > { %v1850_v16 = vadd.f32 %v2280_v38, %v3315_v41 }
 0x23a   : > { %v1844_v51 = vpop.f32.mrf.mxu1 }
 0x23b   : > { %v1916_v4 = vmax.f32 %v1850_v16, 0.0  ;;  %v1845_v30 = vadd.f32 %v3315_v41, %v1844_v51 }
 0x23d   : > { %1948 = vst [vmem:[%s3323_s18 + $0xb8] sm:$0xff] %v1916_v4  ;;  %v1915_v27 = vmax.f32 %v1845_v30, 0.0 }
 0x23f   : > { %1947 = vst [vmem:[%s3323_s18 + $0xb0] sm:$0xff] %v1915_v27 }
 0x241   : > { %v2283_v29 = vpop.f32.mrf.mxu1 }
 0x242   : > { %v1860_v23 = vadd.f32 %v2283_v29, %v3315_v41 }
 0x243   : > { %v1854_v15 = vpop.f32.mrf.mxu1 }
 0x244   : > { %v1918_v56 = vmax.f32 %v1860_v23, 0.0  ;;  %v1855_v3 = vadd.f32 %v3315_v41, %v1854_v15 }
 0x246   : > { %1950 = vst [vmem:[%s3323_s18 + $0xc8] sm:$0xff] %v1918_v56  ;;  %v1917_v8 = vmax.f32 %v1855_v3, 0.0 }
 0x248   : > { %1949 = vst [vmem:[%s3323_s18 + $0xc0] sm:$0xff] %v1917_v8 }
 0x24a   : > { %v2286_v39 = vpop.f32.mrf.mxu1 }
 0x24b   : > { %v1870_v53 = vadd.f32 %v2286_v39, %v3315_v41 }
 0x24c   : > { %v1864_v7 = vpop.f32.mrf.mxu1 }
 0x24d   : > { %v1920_v57 = vmax.f32 %v1870_v53, 0.0  ;;  %v1865_v22 = vadd.f32 %v3315_v41, %v1864_v7 }
 0x24f   : > { %1952 = vst [vmem:[%s3323_s18 + $0xd8] sm:$0xff] %v1920_v57  ;;  %v1919_v45 = vmax.f32 %v1865_v22, 0.0 }
 0x251   : > { %1951 = vst [vmem:[%s3323_s18 + $0xd0] sm:$0xff] %v1919_v45 }
 0x253   : > { %v2289_v5 = vpop.f32.mrf.mxu1 }
 0x254   : > { %v1880_v54 = vadd.f32 %v2289_v5, %v3315_v41 }
 0x255   : > { %v1874_v36 = vpop.f32.mrf.mxu1 }
 0x256   : > { %v1922_v60 = vmax.f32 %v1880_v54, 0.0  ;;  %v1875_v52 = vadd.f32 %v3315_v41, %v1874_v36 }
 0x258   : > { %1954 = vst [vmem:[%s3323_s18 + $0xe8] sm:$0xff] %v1922_v60  ;;  %v1921_v49 = vmax.f32 %v1875_v52, 0.0 }
 0x25a   : > { %1953 = vst [vmem:[%s3323_s18 + $0xe0] sm:$0xff] %v1921_v49 }
 0x25c   : > { %v2292_v32 = vpop.f32.mrf.mxu1 }
 0x25d   : > { %v1890_v61 = vadd.f32 %v2292_v32, %v3315_v41 }
 0x25e   : > { %v1884_v24 = vpop.f32.mrf.mxu1 }
 0x25f   : > { %v1924_v43 = vmax.f32 %v1890_v61, 0.0  ;;  %v1885_v59 = vadd.f32 %v3315_v41, %v1884_v24 }
 0x261   : > { %1956 = vst [vmem:[%s3323_s18 + $0xf8] sm:$0xff] %v1924_v43  ;;  %v1923_v31 = vmax.f32 %v1885_v59, 0.0 }
 0x263   : > { %1955 = vst [vmem:[%s3323_s18 + $0xf0] sm:$0xff] %v1923_v31 }
 0x264 PF: > { %s17_s24 = sadd.s32 1, %s2319_s24  }
 0x265   : > { %p14_p4 = scmp.ge.s32.totalorder %s17_s24, 4  }
 0x267   :  { %16 = sbr.rel (!%p14_p4) target bundleno = 1 (0x1), region = 80 }

</bundles_post_ra>
